<compile_context>
chip_gen: v6e
topology: v6e:2x2x1
jax: 0.10.0
libtpu: 0.0.40
codegen_flags: <defaults>
</compile_context>

<pallas_src>
import functools

import jax
import jax.numpy as jnp
from jax.experimental import pallas as pl
from jax.experimental.pallas import tpu as pltpu

DROPOUT_P = 0.2
KEEP_SCALE = 1.0 / (1.0 - DROPOUT_P)          # plain Python float (no capture)
DROP_THRESHOLD_U8 = int(round(DROPOUT_P * 256))  # drop iff uint8 bits < 51


def _ffn_kernel_eval(x_ref, w1_ref, b1_ref, w2_ref, b2_ref, o_ref):
    h = jnp.dot(x_ref[...].astype(jnp.bfloat16), w1_ref[...],
                preferred_element_type=jnp.float32) + b1_ref[...]
    h = jnp.maximum(h, 0.0)
    y = jnp.dot(h.astype(jnp.bfloat16), w2_ref[...],
                preferred_element_type=jnp.float32) + b2_ref[...]
    o_ref[...] = y.astype(o_ref.dtype)


def _ffn_kernel_train(bits_ref, x_ref, w1_ref, b1_ref, w2_ref, b2_ref, o_ref):
    h = jnp.dot(x_ref[...].astype(jnp.bfloat16), w1_ref[...],
                preferred_element_type=jnp.float32) + b1_ref[...]
    h = jnp.maximum(h, 0.0)
    y = jnp.dot(h.astype(jnp.bfloat16), w2_ref[...],
                preferred_element_type=jnp.float32) + b2_ref[...]
    # Inverted dropout: keep with prob ~(1-p), scale survivors by 1/(1-p).
    # Threshold / scale are Python literals -> jaxpr literals (no closure
    # constants).  uint8 bits: p quantized to 51/256 ~= 0.1992.
    keep_scale = jnp.where(bits_ref[...] >= DROP_THRESHOLD_U8, KEEP_SCALE, 0.0)
    o_ref[...] = (y * keep_scale).astype(o_ref.dtype)


def _pick_row_tile(M):
    # Largest tile (preferring multiples of 256 for v6e/v7x MXU passes) that
    # still leaves >= 2 grid steps, so the "parallel" axis can split across
    # both v7x TensorCores while amortizing the ~0.35us per-step overhead.
    for tm in (512, 256, 128, 64, 32, 16, 8):
        if M >= 2 * tm:
            return tm
    return 8


@functools.partial(jax.jit, static_argnames=("training",))
def feed_forward(x, w1, b1, w2, b2, key, *, training=False):
    """x: (B, T, C) float32 -> (B, T, C) float32.

    w1: (C, H), b1: (H,) or (1, H), w2: (H, C), b2: (C,) or (1, C).
    Weights should be pre-cast to bfloat16 by the caller (cast here only as a
    fallback).  key is used only when training=True (dropout mask).
    """
    B, T, C = x.shape
    H = w1.shape[1]
    assert w1.shape == (C, H) and w2.shape == (H, C), "weight shape mismatch"
    b1 = b1.reshape(1, H)
    b2 = b2.reshape(1, C)

    M = B * T
    x2 = x.reshape(M, C)

    # bf16 operands for the MXU; accumulation stays f32 inside the kernel.
    if w1.dtype != jnp.bfloat16:
        w1 = w1.astype(jnp.bfloat16)
    if w2.dtype != jnp.bfloat16:
        w2 = w2.astype(jnp.bfloat16)

    TM = _pick_row_tile(M)
    # Ragged last block is fine: Pallas masks OOB output writes, and output
    # row i depends only on input row i, so OOB garbage never reaches valid
    # rows.  (Do not introduce cross-row mixing without restoring padding.)
    grid = (pl.cdiv(M, TM),)

    x_spec = pl.BlockSpec((TM, C), lambda i: (i, 0))
    w1_spec = pl.BlockSpec((C, H), lambda i: (0, 0))   # resident (constant idx)
    b1_spec = pl.BlockSpec((1, H), lambda i: (0, 0))
    w2_spec = pl.BlockSpec((H, C), lambda i: (0, 0))
    b2_spec = pl.BlockSpec((1, C), lambda i: (0, 0))
    out_spec = pl.BlockSpec((TM, C), lambda i: (i, 0))

    compiler_params = pltpu.CompilerParams(
        dimension_semantics=("parallel",),   # rows shard across TCs on v7x
    )

    if training:
        # TODO(synk): dropout RNG stream differs from torch.nn.Dropout; only
        # the keep-probability / 1/(1-p) scaling semantics are reproduced.
        bits = jax.random.bits(key, (M, C), dtype=jnp.uint8)
        bits_spec = pl.BlockSpec((TM, C), lambda i: (i, 0))
        out = pl.pallas_call(
            _ffn_kernel_train,
            out_shape=jax.ShapeDtypeStruct((M, C), x.dtype),
            grid=grid,
            in_specs=[bits_spec, x_spec, w1_spec, b1_spec, w2_spec, b2_spec],
            out_specs=out_spec,
            compiler_params=compiler_params,
        )(bits, x2, w1, b1, w2, b2)
    else:
        out = pl.pallas_call(
            _ffn_kernel_eval,
            out_shape=jax.ShapeDtypeStruct((M, C), x.dtype),
            grid=grid,
            in_specs=[x_spec, w1_spec, b1_spec, w2_spec, b2_spec],
            out_specs=out_spec,
            compiler_params=compiler_params,
        )(x2, w1, b1, w2, b2)

    return out.reshape(B, T, C)


if __name__ == "__main__":
    # Small, lane-dense stand-in for n_embed=384 (C multiple of 128, H = 4*C).
    B, T, C = 2, 256, 128
    H = 4 * C

    key = jax.random.PRNGKey(0)
    kx, k1, k2, k3, k4, kdrop = jax.random.split(key, 6)

    x = jax.random.normal(kx, (B, T, C), dtype=jnp.float32)
    w1 = jax.random.normal(k1, (C, H), dtype=jnp.float32) * (1.0 / jnp.sqrt(C))
    b1 = jax.random.normal(k2, (1, H), dtype=jnp.float32) * 0.01
    w2 = jax.random.normal(k3, (H, C), dtype=jnp.float32) * (1.0 / jnp.sqrt(H))
    b2 = jax.random.normal(k4, (1, C), dtype=jnp.float32) * 0.01

    # Pre-cast weights once (hoisted out of the per-call path).
    w1b = w1.astype(jnp.bfloat16)
    w2b = w2.astype(jnp.bfloat16)

    # Eval-mode pass (dropout is identity) -> check against a pure-JAX
    # reference using the same bf16-operand / f32-accumulate contraction.
    y_eval = feed_forward(x, w1b, b1, w2b, b2, kdrop, training=False)
    jax.block_until_ready(y_eval)

    x2 = x.reshape(-1, C)
    h_ref = jnp.dot(x2.astype(jnp.bfloat16), w1b,
                    preferred_element_type=jnp.float32) + b1
    h_ref = jnp.maximum(h_ref, 0.0)
    y_ref = jnp.dot(h_ref.astype(jnp.bfloat16), w2b,
                    preferred_element_type=jnp.float32) + b2
    y_ref = y_ref.reshape(B, T, C)
    assert jnp.allclose(y_eval, y_ref, atol=1e-2, rtol=1e-2), "mismatch vs reference"

    # Train-mode pass (inverted dropout via streamed uint8 random bits).
    y_train = feed_forward(x, w1b, b1, w2b, b2, kdrop, training=True)
    jax.block_until_ready(y_train)
    assert y_train.shape == (B, T, C)
    assert bool(jnp.all(jnp.isfinite(y_train)))
    # Roughly (1-p) of entries should survive (non-zero).
    frac_kept = float(jnp.mean((y_train != 0.0).astype(jnp.float32)))
    assert 0.7 < frac_kept < 0.9, f"unexpected dropout keep fraction {frac_kept}"

    print("KERNEL_OK")
</pallas_src>

<mosaic_0001>
module attributes {stable_mosaic.version = 11 : i64} {
  func.func @_ffn_kernel_eval(%arg0: i32, %arg1: memref<256x128xf32, #tpu.memory_space<vmem>>, %arg2: memref<128x512xbf16, #tpu.memory_space<vmem>>, %arg3: memref<1x512xf32, #tpu.memory_space<vmem>>, %arg4: memref<512x128xbf16, #tpu.memory_space<vmem>>, %arg5: memref<1x128xf32, #tpu.memory_space<vmem>>, %arg6: memref<256x128xf32, #tpu.memory_space<vmem>>) attributes {dimension_semantics = [#tpu.dimension_semantics<parallel>], iteration_bounds = array<i64: 2>, scalar_prefetch = 0 : i64, scratch_operands = 0 : i64, tpu.core_type = #tpu.core_type<tc>, window_params = [{transform_indices = @transform_0, window_bounds = array<i64: 256, 128>}, {pipeline_mode = #tpu.pipeline_mode<synchronous>, transform_indices = @transform_1, window_bounds = array<i64: 128, 512>}, {pipeline_mode = #tpu.pipeline_mode<synchronous>, transform_indices = @transform_2, window_bounds = array<i64: 1, 512>}, {pipeline_mode = #tpu.pipeline_mode<synchronous>, transform_indices = @transform_3, window_bounds = array<i64: 512, 128>}, {pipeline_mode = #tpu.pipeline_mode<synchronous>, transform_indices = @transform_4, window_bounds = array<i64: 1, 128>}, {transform_indices = @transform_5, window_bounds = array<i64: 256, 128>}]} {
    %c0 = arith.constant 0 : index
    %c0_0 = arith.constant 0 : index
    %0 = vector.load %arg1[%c0, %c0_0] : memref<256x128xf32, #tpu.memory_space<vmem>>, vector<256x128xf32>
    %1 = arith.truncf %0 : vector<256x128xf32> to vector<256x128xbf16>
    %c0_1 = arith.constant 0 : index
    %c0_2 = arith.constant 0 : index
    %2 = vector.load %arg2[%c0_1, %c0_2] : memref<128x512xbf16, #tpu.memory_space<vmem>>, vector<128x512xbf16>
    %cst = arith.constant dense<0.000000e+00> : vector<256x512xf32>
    %3 = tpu.matmul %1, %2, %cst {dimension_numbers = #tpu.dot_dimension_numbers<[1], [0], [0], [1], [0, 0, 1, 1], [], []>} : vector<256x128xbf16>, vector<128x512xbf16>, vector<256x512xf32> -> vector<256x512xf32>
    %c0_3 = arith.constant 0 : index
    %c0_4 = arith.constant 0 : index
    %4 = vector.load %arg3[%c0_3, %c0_4] : memref<1x512xf32, #tpu.memory_space<vmem>>, vector<1x512xf32>
    %5 = vector.broadcast %4 : vector<1x512xf32> to vector<256x512xf32>
    %6 = arith.addf %3, %5 : vector<256x512xf32>
    %cst_5 = arith.constant 0.000000e+00 : f32
    %7 = vector.broadcast %cst_5 : f32 to vector<256x512xf32>
    %8 = arith.maximumf %6, %7 : vector<256x512xf32>
    %9 = arith.truncf %8 : vector<256x512xf32> to vector<256x512xbf16>
    %c0_6 = arith.constant 0 : index
    %c0_7 = arith.constant 0 : index
    %10 = vector.load %arg4[%c0_6, %c0_7] : memref<512x128xbf16, #tpu.memory_space<vmem>>, vector<512x128xbf16>
    %cst_8 = arith.constant dense<0.000000e+00> : vector<256x128xf32>
    %11 = tpu.matmul %9, %10, %cst_8 {dimension_numbers = #tpu.dot_dimension_numbers<[1], [0], [0], [1], [0, 0, 1, 1], [], []>} : vector<256x512xbf16>, vector<512x128xbf16>, vector<256x128xf32> -> vector<256x128xf32>
    %c0_9 = arith.constant 0 : index
    %c0_10 = arith.constant 0 : index
    %12 = vector.load %arg5[%c0_9, %c0_10] : memref<1x128xf32, #tpu.memory_space<vmem>>, vector<1x128xf32>
    %13 = vector.broadcast %12 : vector<1x128xf32> to vector<256x128xf32>
    %14 = arith.addf %11, %13 : vector<256x128xf32>
    %c0_11 = arith.constant 0 : index
    %c0_12 = arith.constant 0 : index
    %15 = vector.load %arg6[%c0_11, %c0_12] : memref<256x128xf32, #tpu.memory_space<vmem>>, vector<256x128xf32>
    tpu.vector_store %arg6[%c0_11, %c0_12], %14 {strides = array<i32>} : memref<256x128xf32, #tpu.memory_space<vmem>>, vector<256x128xf32>,
    return
  }
  func.func @transform_0(%arg0: i32) -> (i32, i32) {
    %c0_i32 = arith.constant 0 : i32
    %c0_i32_0 = arith.constant 0 : i32
    return %arg0, %c0_i32 : i32, i32
  }
  func.func @transform_1(%arg0: i32) -> (i32, i32) {
    %c0_i32 = arith.constant 0 : i32
    %c0_i32_0 = arith.constant 0 : i32
    %c0_i32_1 = arith.constant 0 : i32
    return %c0_i32, %c0_i32_0 : i32, i32
  }
  func.func @transform_2(%arg0: i32) -> (i32, i32) {
    %c0_i32 = arith.constant 0 : i32
    %c0_i32_0 = arith.constant 0 : i32
    %c0_i32_1 = arith.constant 0 : i32
    return %c0_i32, %c0_i32_0 : i32, i32
  }
  func.func @transform_3(%arg0: i32) -> (i32, i32) {
    %c0_i32 = arith.constant 0 : i32
    %c0_i32_0 = arith.constant 0 : i32
    %c0_i32_1 = arith.constant 0 : i32
    return %c0_i32, %c0_i32_0 : i32, i32
  }
  func.func @transform_4(%arg0: i32) -> (i32, i32) {
    %c0_i32 = arith.constant 0 : i32
    %c0_i32_0 = arith.constant 0 : i32
    %c0_i32_1 = arith.constant 0 : i32
    return %c0_i32, %c0_i32_0 : i32, i32
  }
  func.func @transform_5(%arg0: i32) -> (i32, i32) {
    %c0_i32 = arith.constant 0 : i32
    %c0_i32_0 = arith.constant 0 : i32
    return %arg0, %c0_i32 : i32, i32
  }
}

</mosaic_0001>

<bundles_post_ra>
// kernel: feed_forward.1
= control target key start
LH: loop header
LB: loop body
LE: loop exit
PB: predicated region body
PF: predicated region fallthrough
CT: control target
= control target key end

     0   :  { %10 = vsyncpa [#allocation3], 0  ;;  %s2965_s0 = inlined_call_operand.hbm [shape: f32[512,128], index: 0, kind: input, shape index: {}]   ;;  %s2966_s1 = inlined_call_operand.hbm [shape: bf16[128,512], index: 1, kind: input, shape index: {}]   ;;  %s2967_s2 = inlined_call_operand.vmem [shape: f32[1,512], index: 2, kind: input, shape index: {}]   ;;  %s2968_s3 = inlined_call_operand.hbm [shape: bf16[512,128], index: 3, kind: input, shape index: {}]   ;;  %s2969_s4 = inlined_call_operand.vmem [shape: f32[1,128], index: 4, kind: input, shape index: {}]   ;;  %s2970_s5 = inlined_call_operand.hbm [shape: f32[512,128], index: 5, kind: output, shape index: {}]  }
   0x1   :  { %12 = vsyncpa [#allocation3 + $0x1], 0 }
   0x2   :  { %13 = vsyncpa [#allocation6], 0 }
   0x3   :  { %14 = vsyncpa [#allocation4], 0 }
   0x4   :  { %16 = vsyncpa [#allocation4 + $0x1], 0  ;;  %s2496_s18 = smov 0   ;;  %s2498_s19 = smov 0  }
   0x5   :  { %s2500_s20 = smov 0   ;;  %s2502_s21 = smov 0  }
   0x6 LB: > { %s2517_s22 = sadd.s32 4294967295, %s2451_s21   ;;  %s1838_s23 = sadd.s32 4294967294, %s2451_s21   ;;  %s2451_s21 = sphi %s2502_s21, %s2992_s21   ;;  %s2447_s20 = sphi %s2500_s20, %s2991_s20   ;;  %s2443_s19 = sphi %s2498_s19, %s2990_s19   ;;  %s2439_s18 = sphi %s2496_s18, %s2989_s18  }
   0x7   : > { %p42_p0 = scmp.ne.s32.totalorder %s2443_s19, %s2439_s18  ;;  %p2971_p1 = scmp.eq.s32.totalorder %s2517_s22, 0 }
   0x8   : > { %p156_p3 = scmp.eq.s32.totalorder %s1838_s23, 1  ;;  %p1839_p5 = scmp.ge.s32.totalorder %s2451_s21, 1 }
   0x9   : > { %p2526_p4 = por %p2971_p1, %p42_p0  ;;  %p163_p7 = scmp.lt.s32.totalorder %s2451_s21, 3 }
   0xa   : > { %p2531_p6 = por %p156_p3, %p42_p0  ;;  %s2453_s27 = smov [#allocation5]  }
   0xb   : > { %s2975_s24 = scalar_select %p2526_p4, 1, 0 }
   0xc   : > { %s2976_s25 = scalar_select %p2531_p6, 1, 0 }
   0xd   : > { %p2536_p8 = pnand %p1839_p5, %p163_p7  ;;  %s175_s28 = sshll.u32 %s2453_s27, 4  ;;  %s176_s28 = int_to_ptr.vmem [resolvable:$true] %s175_s28 }
   0xe   : > { %s2454_s30 = smov [#allocation7]   ;;  %s2314_s7 = scalar_lea.vmem %s176_s28, 4096 }
   0xf   : > { %s2977_s26 = scalar_select %p2536_p8, 1, 0 }
  0x10   : > { %p2159_p9 = pneg %p2536_p8  ;;  %s191_s6 = sshll.u32 %s2454_s30, 4  ;;  %s192_s6 = int_to_ptr.vmem [resolvable:$true] %s191_s6 }
  0x11   : > { %p2315_p13 = scmp.ne.s32.totalorder %s176_s28, %s2314_s7  ;;  %p2322_p5 = scmp.lt.s32.totalorder %s176_s28, %s176_s28 }
  0x12   : > { %p2545_p11 = pnand %p2159_p9, %p2971_p1  ;;  %p2323_p7 = scmp.lt.s32.totalorder %s2314_s7, %s2314_s7 }
  0x14   : > { %p2305_p12 = pneg %p2545_p11  ;;  %p2324_p10 = por %p2323_p7, %p2322_p5 }
  0x16   : > { %p2317_p0 = pnand %p2315_p13, %p2305_p12 }
  0x18   : > { %p2318_p3 = pneg %p2317_p0 }
  0x1a   : > { %p2325_p9 = pnand %p2324_p10, %p2318_p3 }
  0x1c   : > { %2328 = shalt.err (!%p2325_p9)
}
  0x1d   : > { %s2455_s8 = smov 256   ;;  %s2456_s9 = smov 16  }
  0x1e   : > { %2162 = dma.hbm_to_vmem [thread:$0]  (!%p2545_p11), %s2966_s1, 4096, %s176_s28, [#allocation6], %s2455_s8, %s2455_s8, %s2456_s9  }
  0x1f   : > { %s2340_s12 = scalar_lea.vmem %s192_s6, 4096  ;;  %p2348_p2 = scmp.lt.s32.totalorder %s192_s6, %s192_s6 }
  0x20   : > { %p2341_p1 = scmp.ne.s32.totalorder %s192_s6, %s2340_s12  ;;  %p2349_p6 = scmp.lt.s32.totalorder %s2340_s12, %s2340_s12 }
  0x22   : > { %p2343_p13 = pnand %p2341_p1, %p2305_p12  ;;  %p2350_p5 = por %p2349_p6, %p2348_p2 }
  0x24   : > { %p2344_p0 = pneg %p2343_p13 }
  0x26   : > { %p2351_p10 = pnand %p2350_p5, %p2344_p0 }
  0x28   : > { %2354 = shalt.err (!%p2351_p10)
}
  0x29   : > { %s2457_s13 = smov 64   ;;  %s2458_s14 = smov 4  }
  0x2a   : > { %2165 = dma.hbm_to_vmem [thread:$0]  (!%p2545_p11), %s2968_s3, 4096, %s192_s6, [#allocation6], %s2457_s13, %s2457_s13, %s2458_s14  }
  0x2b   : > { %s2568_s17 = sadd.s32 1, %s2451_s21   ;;  %s29_s27 = sadd.s32 1, %s2447_s20 }
  0x2c   : > { %s26_s23 = ssub.s32 %s2451_s21, %s2568_s17  ;;  %p36_p2 = scmp.ne.s32.totalorder %s2447_s20, %s2443_s19 }
  0x2d   : > { %p27_p1 = scmp.eq.s32.totalorder %s26_s23, 0  ;;  %p37_p6 = scmp.eq.s32.totalorder %s2451_s21, 0 }
  0x2e   : > { %p2979_p3 = scmp.eq.s32.totalorder %s2517_s22, 1  ;;  %p2176_p9 = scmp.lt.s32.totalorder %s2451_s21, 2 }
  0x2f   : > { %s2577_s28 = scalar_select %p27_p1, %s2447_s20, %s29_s27  }
  0x30   : > { %p38_p12 = por %p37_p6, %p36_p2  ;;  %p2581_p7 = por %p2979_p3, %p36_p2 }
  0x31   : > { %s208_s29 = sand.u32 1, %s2447_s20   ;;  %s1921_s6 = sshll.u32 %s2451_s21, 12 }
  0x32   : > { %s2980_s30 = scalar_select %p2581_p7, 1, 0 }
  0x33   : > { %s1843_s7 = sshll.u32 %s208_s29, 8  ;;  %s2591_s10 = scalar_lea.hbm %s2965_s0, %s1921_s6 }
  0x34   : > { %s212_s11 = scalar_lea.vmem [#allocation2], %s1843_s7  ;;  %p2595_p11 = pnand %p2176_p9, %p38_p12 }
  0x35   : > { %s219_s12 = sshll.u32 %s212_s11, 4  ;;  %s2599_s14 = scalar_lea.sflag [#allocation3], %s208_s29  ;;  %s2593_s12 = int_to_ptr.vmem [resolvable:$true] %s219_s12 }
  0x36   : > { %s2355_s15 = scalar_lea.hbm %s2591_s10, 4096  ;;  %p2357_p0 = pneg %p2595_p11 }
  0x37   : > { %p2356_p13 = scmp.ne.s32.totalorder %s2591_s10, %s2355_s15  ;;  %s2360_s27 = scalar_lea.hbm %s2965_s0, 8192 }
  0x38   : > { %p2361_p1 = scmp.lt.s32.totalorder %s2591_s10, %s2965_s0  ;;  %p2362_p2 = scmp.lt.s32.totalorder %s2360_s27, %s2355_s15 }
  0x39   : > { %p2358_p5 = pnand %p2357_p0, %p2356_p13 }
  0x3a   : > { %p2363_p6 = por %p2362_p2, %p2361_p1 }
  0x3b   : > { %p2359_p10 = pneg %p2358_p5 }
  0x3d   : > { %p2364_p12 = pnand %p2363_p6, %p2359_p10 }
  0x3f   : > { %2367 = shalt.err (!%p2364_p12)
}
  0x40   : > { %s2368_s29 = scalar_lea.vmem %s2593_s12, 4096  ;;  %s2459_s8 = smov [#allocation2]  }
  0x41   : > { %p2369_p3 = scmp.ne.s32.totalorder %s2593_s12, %s2368_s29  ;;  %s2373_s9 = sshll.u32 %s2459_s8, 4  ;;  %s2374_s9 = int_to_ptr.vmem [resolvable:$false] %s2373_s9 }
  0x42   : > { %s2375_s11 = scalar_lea.vmem %s2374_s9, 8192  ;;  %p2376_p5 = scmp.lt.s32.totalorder %s2593_s12, %s2374_s9 }
  0x43   : > { %p2371_p9 = pnand %p2369_p3, %p2357_p0  ;;  %p2377_p7 = scmp.lt.s32.totalorder %s2375_s11, %s2368_s29 }
  0x45   : > { %p2372_p13 = pneg %p2371_p9  ;;  %p2378_p4 = por %p2377_p7, %p2376_p5 }
  0x47   : > { %p2379_p8 = pnand %p2378_p4, %p2372_p13 }
  0x49   : > { %2382 = shalt.err (!%p2379_p8)
}
  0x4a   : > { %s2460_s15 = smov 128   ;;  %s2461_s16 = smov 8  }
  0x4b   : > { %2169 = dma.hbm_to_vmem [thread:$0]  (!%p2595_p11), %s2591_s10, 4096, %s2593_s12, %s2599_s14, %s2460_s15, %s2460_s15, %s2461_s16  }
  0x4c   : > { %p2982_p0 = scmp.ne.s32.totalorder %s2977_s26, 0 }
  0x4d   : > { %s2623_s23 = sand.u32 (!%p2982_p0), 1, %s2443_s19   ;;  %p2983_p4 = scmp.ne.s32.totalorder (!%p2982_p0), %s2975_s24, 0 }
  0x4e   : > { %231 = sbr.rel (%p2982_p0) target bundleno = 666 (0x29a), region = 40  ;;  %s1847_s27 = sshll.u32 (!%p2982_p0), %s2623_s23, 8 }
  0x4f   : > { %s234_s7 = scalar_lea.sflag (!%p2982_p0), [#allocation3], %s2623_s23  ;;  %s2629_s6 = scalar_lea.vmem (!%p2982_p0), [#allocation2], %s1847_s27 }
  0x53   : > { %2426 = dma.done.wait (%p2983_p4), %s234_s7, 4096  }
  0x54   : > { %2428 = vsyncadd (%p2983_p4), %s234_s7, 4294963200  ;;  %p2984_p8 = scmp.eq.s32.totalorder %s2517_s22, 0 }
  0x56   : > { %2430 = dma.done.wait (%p2984_p8), [#allocation6], 8192   ;;  %p2985_p7 = pmov %p2984_p8 }
  0x57   : > { %v2462_v0 = vmov 0   ;;  %v2223_v1 = vld [vmem:[#allocation5 + $0xe4] ss:$16 sps:$4 sm:$0xff]   ;;  %v2225_v2 = vld [vmem:[#allocation5 + $0xec] ss:$16 sps:$4 sm:$0xff]   ;;  %s2850_s13 = scalar_lea.vmem [#allocation8], %s1847_s27 }
  0x58   : > { %2432 = vsyncadd (%p2985_p7), [#allocation6], 4294959104  ;;  %569 = vmatprep.mubr.bf16.mxu0 %v2462_v0  ;;  %762 = vmatprep.mubr.bf16.mxu1 %v2462_v0  ;;  %v2227_v3 = vld [vmem:[#allocation5 + $0xe0] ss:$16 sps:$4 sm:$0xff]   ;;  %v2228_v4 = vld [vmem:[#allocation5 + $0xe8] ss:$16 sps:$4 sm:$0xff]  }
  0x59   : > { %537 = vmatprep.subr.bf16.mxu0 %v2223_v1  ;;  %730 = vmatprep.subr.bf16.mxu1 %v2225_v2  ;;  %v2229_v5 = vld [vmem:[#allocation5 + $0xc4] ss:$16 sps:$4 sm:$0xff]   ;;  %v2231_v6 = vld [vmem:[#allocation5 + $0xcc] ss:$16 sps:$4 sm:$0xff]   ;;  %v2233_v7 = vld [vmem:[#allocation5 + $0xc0] ss:$16 sps:$4 sm:$0xff]  }
  0x5a   : > { %538 = vmatpush1.bf16.msra.mxu0 %v2227_v3  ;;  %731 = vmatpush1.bf16.msra.mxu1 %v2228_v4  ;;  %v2234_v8 = vld [vmem:[#allocation5 + $0xc8] ss:$16 sps:$4 sm:$0xff]   ;;  %v2235_v9 = vld [vmem:[#allocation5 + $0xa4] ss:$16 sps:$4 sm:$0xff]   ;;  %v2237_v10 = vld [vmem:[#allocation5 + $0xac] ss:$16 sps:$4 sm:$0xff]  }
  0x5b   : > { %539 = vmatprep.subr.bf16.mxu0 %v2229_v5  ;;  %732 = vmatprep.subr.bf16.mxu1 %v2231_v6  ;;  %v2239_v11 = vld [vmem:[#allocation5 + $0xa0] ss:$16 sps:$4 sm:$0xff]   ;;  %v2240_v12 = vld [vmem:[#allocation5 + $0xa8] ss:$16 sps:$4 sm:$0xff]   ;;  %v2241_v13 = vld [vmem:[#allocation5 + $0x84] ss:$16 sps:$4 sm:$0xff]  }
  0x5c   : > { %v2243_v14 = vld [vmem:[#allocation5 + $0x8c] ss:$16 sps:$4 sm:$0xff]   ;;  %v2245_v15 = vld [vmem:[#allocation5 + $0x80] ss:$16 sps:$4 sm:$0xff]   ;;  %v2246_v16 = vld [vmem:[#allocation5 + $0x88] ss:$16 sps:$4 sm:$0xff]  }
  0x5d   : > { %v2247_v17 = vld [vmem:[#allocation5 + $0x64] ss:$16 sps:$4 sm:$0xff]   ;;  %v2249_v18 = vld [vmem:[#allocation5 + $0x6c] ss:$16 sps:$4 sm:$0xff]   ;;  %v2251_v19 = vld [vmem:[#allocation5 + $0x60] ss:$16 sps:$4 sm:$0xff]  }
  0x5e   : > { %540 = vmatpush1.bf16.msra.mxu0 %v2233_v7  ;;  %733 = vmatpush1.bf16.msra.mxu1 %v2234_v8  ;;  %v2252_v20 = vld [vmem:[#allocation5 + $0x68] ss:$16 sps:$4 sm:$0xff]   ;;  %v2253_v21 = vld [vmem:[#allocation5 + $0x44] ss:$16 sps:$4 sm:$0xff]   ;;  %v2255_v22 = vld [vmem:[#allocation5 + $0x4c] ss:$16 sps:$4 sm:$0xff]  }
  0x5f   : > { %541 = vmatprep.subr.bf16.mxu0 %v2235_v9  ;;  %734 = vmatprep.subr.bf16.mxu1 %v2237_v10  ;;  %v2257_v23 = vld [vmem:[#allocation5 + $0x40] ss:$16 sps:$4 sm:$0xff]   ;;  %v2258_v24 = vld [vmem:[#allocation5 + $0x48] ss:$16 sps:$4 sm:$0xff]   ;;  %v2259_v25 = vld [vmem:[#allocation5 + $0x24] ss:$16 sps:$4 sm:$0xff]  }
  0x60   : > { %v2261_v26 = vld [vmem:[#allocation5 + $0x2c] ss:$16 sps:$4 sm:$0xff]   ;;  %v2263_v27 = vld [vmem:[#allocation5 + $0x20] ss:$16 sps:$4 sm:$0xff]   ;;  %v2264_v28 = vld [vmem:[#allocation5 + $0x28] ss:$16 sps:$4 sm:$0xff]  }
  0x61   : > { %v2265_v29 = vld [vmem:[#allocation5 + $0x4] ss:$16 sps:$4 sm:$0xff]   ;;  %v2267_v30 = vld [vmem:[#allocation5 + $0xc] ss:$16 sps:$4 sm:$0xff]   ;;  %v2269_v31 = vld [vmem:[#allocation5] ss:$16 sps:$4 sm:$0xff]  }
  0x62   : > { %542 = vmatpush1.bf16.msra.mxu0 %v2239_v11  ;;  %735 = vmatpush1.bf16.msra.mxu1 %v2240_v12  ;;  %v2270_v32 = vld [vmem:[#allocation5 + $0x8] ss:$16 sps:$4 sm:$0xff]   ;;  %v275_v33 = vld [vmem:[%s2629_s6] sm:$0xff]  ;;  %v2275_v40 = vld [vmem:[#allocation7 + $0x70] sm:$0xff]   ;;  %s1922_s14 = sshll.u32 %s2517_s22, 12  ;;  %s1746_s29 = sshll.u32 %s2850_s13, 4  ;;  %s2921_s29 = int_to_ptr.vmem [resolvable:$true] %s1746_s29 }
  0x63   : > { %543 = vmatprep.subr.bf16.mxu0 %v2241_v13  ;;  %736 = vmatprep.subr.bf16.mxu1 %v2243_v14  ;;  %v276_v34 = vld [vmem:[%s2629_s6 + $0x8] sm:$0xff]  ;;  %v2271_v35 = vld [vmem:[#allocation7 + $0x78] sm:$0xff]   ;;  %v277_v41 = vld [vmem:[%s2629_s6 + $0x10] sm:$0xff]  ;;  %s2919_s11 = scalar_lea.hbm %s2970_s5, %s1922_s14  ;;  %s1733_s15 = scalar_lea.sflag [#allocation4], %s2623_s23 }
  0x64   : > { %v2273_v36 = vld [vmem:[#allocation7 + $0xf8] sm:$0xff]   ;;  %v307_v37 = vpack.c.bf16 %v276_v34, %v275_v33  ;;  %v2276_v43 = vld [vmem:[#allocation7 + $0x30] sm:$0xff]   ;;  %v2279_v47 = vld [vmem:[#allocation7 + $0x68] sm:$0xff]   ;;  %s2383_s16 = scalar_lea.vmem %s2921_s29, 4096  ;;  %p2986_p10 = scmp.ne.s32.totalorder %s2980_s30, 0 }
  0x65   : > { %v2272_v38 = vld [vmem:[#allocation7 + $0x38] sm:$0xff]   ;;  %v2277_v44 = vld [vmem:[#allocation7 + $0xf0] sm:$0xff]   ;;  %v2280_v48 = vld [vmem:[#allocation7 + $0x28] sm:$0xff]   ;;  %p2384_p11 = scmp.ne.s32.totalorder %s2921_s29, %s2383_s16  ;;  %s2463_s22 = smov [#allocation8]  }
  0x66   : > { %544 = vmatpush1.bf16.msra.mxu0 %v2245_v15  ;;  %737 = vmatpush1.bf16.msra.mxu1 %v2246_v16  ;;  %v2274_v39 = vld [vmem:[#allocation7 + $0xb8] sm:$0xff]   ;;  %v2278_v45 = vld [vmem:[#allocation7 + $0xb0] sm:$0xff]   ;;  %v2281_v49 = vld [vmem:[#allocation7 + $0xe8] sm:$0xff]   ;;  %s2387_s27 = sshll.u32 %s2463_s22, 4  ;;  %s2388_s27 = int_to_ptr.vmem [resolvable:$false] %s2387_s27 }
  0x67   : > { %545 = vmatprep.subr.bf16.mxu0 %v2247_v17  ;;  %738 = vmatprep.subr.bf16.mxu1 %v2249_v18  ;;  %v278_v42 = vld [vmem:[%s2629_s6 + $0x18] sm:$0xff]  ;;  %v279_v50 = vld [vmem:[%s2629_s6 + $0x20] sm:$0xff]  ;;  %v280_v51 = vld [vmem:[%s2629_s6 + $0x28] sm:$0xff]  ;;  %p2385_p1 = pnand %p2384_p11, %p2986_p10  ;;  %s2389_s7 = scalar_lea.vmem %s2388_s27, 8192 }
  0x68   : > { %v308_v46 = vpack.c.bf16 %v278_v42, %v277_v41  ;;  %v2282_v52 = vld [vmem:[#allocation7 + $0xa8] sm:$0xff]   ;;  %v2283_v53 = vld [vmem:[#allocation7 + $0x60] sm:$0xff]   ;;  %v309_v56 = vpack.c.bf16 %v280_v51, %v279_v50  ;;  %v2287_v58 = vld [vmem:[#allocation7 + $0x58] sm:$0xff]   ;;  %v357_v50 = vlaneseq  ;;  %p2390_p6 = scmp.lt.s32.totalorder %s2921_s29, %s2388_s27  ;;  %p2391_p12 = scmp.lt.s32.totalorder %s2389_s7, %s2383_s16 }
  0x69   : > { %v2284_v54 = vld [vmem:[#allocation7 + $0x20] sm:$0xff]   ;;  %v2288_v59 = vld [vmem:[#allocation7 + $0x18] sm:$0xff]   ;;  %v281_v60 = vld [vmem:[%s2629_s6 + $0x30] sm:$0xff]  ;;  %p2386_p2 = pneg %p2385_p1 }
  0x6a   : > { %546 = vmatpush1.bf16.msra.mxu0 %v2251_v19  ;;  %739 = vmatpush1.bf16.msra.mxu1 %v2252_v20  ;;  %v2285_v55 = vld [vmem:[#allocation7 + $0xe0] sm:$0xff]   ;;  %v282_v61 = vld [vmem:[%s2629_s6 + $0x38] sm:$0xff]  ;;  %v2291_v1 = vld [vmem:[#allocation7 + $0x50] sm:$0xff]   ;;  %v358_v51 = vshrl.u32 %v357_v50, 7  ;;  %p2392_p3 = por %p2391_p12, %p2390_p6 }
  0x6b   : > { %547 = vmatprep.subr.bf16.mxu0 %v2253_v21  ;;  %740 = vmatprep.subr.bf16.mxu1 %v2255_v22  ;;  %v2286_v57 = vld [vmem:[#allocation7 + $0xa0] sm:$0xff]   ;;  %v2289_v62 = vld [vmem:[#allocation7 + $0xd8] sm:$0xff]   ;;  %v2292_v2 = vld [vmem:[#allocation7 + $0x10] sm:$0xff]   ;;  %v310_v4 = vpack.c.bf16 %v282_v61, %v281_v60 }
  0x6c   : > { %v2290_v63 = vld [vmem:[#allocation7 + $0x98] sm:$0xff]   ;;  %v2293_v3 = vld [vmem:[#allocation7 + $0xd0] sm:$0xff]   ;;  %v2295_v6 = vld [vmem:[#allocation7 + $0x48] sm:$0xff]   ;;  %p2393_p9 = pnand %p2392_p3, %p2386_p2 }
  0x6d   : > { %v2294_v5 = vld [vmem:[#allocation7 + $0x90] sm:$0xff]   ;;  %v2296_v7 = vld [vmem:[#allocation7 + $0x8] sm:$0xff]   ;;  %v283_v8 = vld [vmem:[%s2629_s6 + $0x40] sm:$0xff] }
  0x6e   : > { %548 = vmatpush1.bf16.msra.mxu0 %v2257_v23  ;;  %741 = vmatpush1.bf16.msra.mxu1 %v2258_v24  ;;  %v284_v9 = vld [vmem:[%s2629_s6 + $0x48] sm:$0xff]  ;;  %v2299_v12 = vld [vmem:[#allocation7 + $0x40] sm:$0xff]   ;;  %v285_v16 = vld [vmem:[%s2629_s6 + $0x50] sm:$0xff] }
  0x6f   : > { %549 = vmatprep.subr.bf16.mxu0 %v2259_v25  ;;  %742 = vmatprep.subr.bf16.mxu1 %v2261_v26  ;;  %v2297_v10 = vld [vmem:[#allocation7 + $0xc8] sm:$0xff]   ;;  %v2300_v13 = vld [vmem:[#allocation7] sm:$0xff]   ;;  %v311_v15 = vpack.c.bf16 %v284_v9, %v283_v8  ;;  %v286_v17 = vld [vmem:[%s2629_s6 + $0x58] sm:$0xff] }
  0x70   : > { %v2298_v11 = vld [vmem:[#allocation7 + $0x88] sm:$0xff]   ;;  %v2301_v14 = vld [vmem:[#allocation7 + $0xc0] sm:$0xff]   ;;  %v312_v18 = vpack.c.bf16 %v286_v17, %v285_v16  ;;  %v289_v22 = vld [vmem:[%s2629_s6 + $0x70] sm:$0xff] }
  0x71   : > { %v287_v19 = vld [vmem:[%s2629_s6 + $0x60] sm:$0xff]  ;;  %v288_v20 = vld [vmem:[%s2629_s6 + $0x68] sm:$0xff]  ;;  %v290_v23 = vld [vmem:[%s2629_s6 + $0x78] sm:$0xff] }
  0x72   : > { %550 = vmatpush1.bf16.msra.mxu0 %v2263_v27  ;;  %743 = vmatpush1.bf16.msra.mxu1 %v2264_v28  ;;  %v313_v21 = vpack.c.bf16 %v288_v20, %v287_v19  ;;  %v314_v24 = vpack.c.bf16 %v290_v23, %v289_v22  ;;  %v291_v25 = vld [vmem:[%s2629_s6 + $0x80] sm:$0xff]  ;;  %v292_v26 = vld [vmem:[%s2629_s6 + $0x88] sm:$0xff]  ;;  %v293_v28 = vld [vmem:[%s2629_s6 + $0x90] sm:$0xff] }
  0x73   : > { %551 = vmatprep.subr.bf16.mxu0 %v2265_v29  ;;  %744 = vmatprep.subr.bf16.mxu1 %v2267_v30  ;;  %v315_v27 = vpack.c.bf16 %v292_v26, %v291_v25  ;;  %v294_v29 = vld [vmem:[%s2629_s6 + $0x98] sm:$0xff]  ;;  %v2302_v30 = vld [vmem:[#allocation7 + $0x80] sm:$0xff]   ;;  %v296_v33 = vld [vmem:[%s2629_s6 + $0xa8] sm:$0xff] }
  0x74   : > { %v301_v41 = vld [vmem:[%s2629_s6 + $0xd0] sm:$0xff]  ;;  %v302_v42 = vld [vmem:[%s2629_s6 + $0xd8] sm:$0xff] }
  0x76   : > { %552 = vmatpush1.bf16.msra.mxu0 %v2269_v31  ;;  %745 = vmatpush1.bf16.msra.mxu1 %v2270_v32  ;;  %v316_v31 = vpack.c.bf16 %v294_v29, %v293_v28  ;;  %v295_v32 = vld [vmem:[%s2629_s6 + $0xa0] sm:$0xff] }
  0x77   : > { %1923 = vmatprep.subr.bf16.mxu0 %v2271_v35  ;;  %2035 = vmatprep.subr.bf16.mxu1 %v2273_v36  ;;  %v317_v34 = vpack.c.bf16 %v296_v33, %v295_v32  ;;  %v297_v35 = vld [vmem:[%s2629_s6 + $0xb0] sm:$0xff]  ;;  %v298_v36 = vld [vmem:[%s2629_s6 + $0xb8] sm:$0xff] }
  0x79   : > { %570 = vmatmul.mubr.bf16.vlgmr.msra.gmra.mxu0 %v307_v37  ;;  %763 = vmatmul.mubr.bf16.vlgmr.msra.gmra.mxu1 %v307_v37  ;;  %v318_v37 = vpack.c.bf16 %v298_v36, %v297_v35 }
  0x7a   : > { %579 = vmatprep.mubr.bf16.mxu0 %v2462_v0  ;;  %772 = vmatprep.mubr.bf16.mxu1 %v2462_v0 }
  0x7b   : > { %1924 = vmatpush3.bf16.msra.mxu0 %v2272_v38  ;;  %2036 = vmatpush3.bf16.msra.mxu1 %v2274_v39  ;;  %v299_v38 = vld [vmem:[%s2629_s6 + $0xc0] sm:$0xff]  ;;  %v300_v39 = vld [vmem:[%s2629_s6 + $0xc8] sm:$0xff] }
  0x7c   : > { %1925 = vmatprep.subr.bf16.mxu0 %v2275_v40  ;;  %2037 = vmatprep.subr.bf16.mxu1 %v2277_v44  ;;  %v319_v40 = vpack.c.bf16 %v300_v39, %v299_v38  ;;  %v303_v44 = vld [vmem:[%s2629_s6 + $0xe0] sm:$0xff] }
  0x7f   : > { %1926 = vmatpush3.bf16.msra.mxu0 %v2276_v43  ;;  %2038 = vmatpush3.bf16.msra.mxu1 %v2278_v45  ;;  %v320_v43 = vpack.c.bf16 %v302_v42, %v301_v41  ;;  %v304_v45 = vld [vmem:[%s2629_s6 + $0xe8] sm:$0xff] }
  0x80   : > { %1927 = vmatprep.subr.bf16.mxu0 %v2279_v47  ;;  %2039 = vmatprep.subr.bf16.mxu1 %v2281_v49  ;;  %v305_v47 = vld [vmem:[%s2629_s6 + $0xf0] sm:$0xff] }
  0x81   : > { %580 = vmatmul.mubr.bf16.gmra.mxu0 %v308_v46  ;;  %773 = vmatmul.mubr.bf16.gmra.mxu1 %v308_v46  ;;  %v321_v46 = vpack.c.bf16 %v304_v45, %v303_v44 }
  0x82   : > { %589 = vmatprep.mubr.bf16.mxu0 %v2462_v0  ;;  %782 = vmatprep.mubr.bf16.mxu1 %v2462_v0 }
  0x83   : > { %1928 = vmatpush3.bf16.msra.mxu0 %v2280_v48  ;;  %2040 = vmatpush3.bf16.msra.mxu1 %v2282_v52  ;;  %v306_v48 = vld [vmem:[%s2629_s6 + $0xf8] sm:$0xff]  ;;  %v363_v52 = vsub.s32 1, %v358_v51 }
  0x84   : > { %1929 = vmatprep.subr.bf16.mxu0 %v2283_v53  ;;  %2041 = vmatprep.subr.bf16.mxu1 %v2285_v55  ;;  %v322_v49 = vpack.c.bf16 %v306_v48, %v305_v47  ;;  %v371_v53 = vsub.s32 3, %v358_v51  ;;  %v367_v55 = vsub.s32 2, %v358_v51 }
  0x87   : > { %1930 = vmatpush3.bf16.msra.mxu0 %v2284_v54  ;;  %2042 = vmatpush3.bf16.msra.mxu1 %v2286_v57  ;;  %v359_v54 = vsub.s32 0, %v358_v51 }
  0x88   : > { %1931 = vmatprep.subr.bf16.mxu0 %v2287_v58  ;;  %2043 = vmatprep.subr.bf16.mxu1 %v2289_v62 }
  0x89   : > { %590 = vmatmul.mubr.bf16.gmra.mxu0 %v309_v56  ;;  %783 = vmatmul.mubr.bf16.gmra.mxu1 %v309_v56  ;;  %v355_v56 = vld [vmem:[%s2967_s2] sm:$0xf] }
  0x8a   : > { %599 = vmatprep.mubr.bf16.mxu0 %v2462_v0  ;;  %792 = vmatprep.mubr.bf16.mxu1 %v2462_v0  ;;  %v2710_v60 = vrot.slane %v355_v56, %v359_v54  ;;  %v2712_v61 = vrot.slane %v355_v56, %v367_v55 }
  0x8b   : > { %1932 = vmatpush3.bf16.msra.mxu0 %v2288_v59  ;;  %2044 = vmatpush3.bf16.msra.mxu1 %v2290_v63  ;;  %v2706_v59 = vrot.slane %v355_v56, %v363_v52 }
  0x8c   : > { %1933 = vmatprep.subr.bf16.mxu0 %v2291_v1  ;;  %2045 = vmatprep.subr.bf16.mxu1 %v2293_v3 }
  0x8f   : > { %1934 = vmatpush3.bf16.msra.mxu0 %v2292_v2  ;;  %2046 = vmatpush3.bf16.msra.mxu1 %v2294_v5 }
  0x90   : > { %1935 = vmatprep.subr.bf16.mxu0 %v2295_v6  ;;  %2047 = vmatprep.subr.bf16.mxu1 %v2297_v10 }
  0x91   : > { %600 = vmatmul.mubr.bf16.gmra.mxu0 %v310_v4  ;;  %793 = vmatmul.mubr.bf16.gmra.mxu1 %v310_v4 }
  0x92   : > { %609 = vmatprep.mubr.bf16.mxu0 %v2462_v0  ;;  %802 = vmatprep.mubr.bf16.mxu1 %v2462_v0 }
  0x93   : > { %1936 = vmatpush3.bf16.msra.mxu0 %v2296_v7  ;;  %2048 = vmatpush3.bf16.msra.mxu1 %v2298_v11 }
  0x94   : > { %1937 = vmatprep.subr.bf16.mxu0 %v2299_v12  ;;  %2049 = vmatprep.subr.bf16.mxu1 %v2301_v14 }
  0x97   : > { %1938 = vmatpush3.bf16.msra.mxu0 %v2300_v13  ;;  %2050 = vmatpush3.bf16.msra.mxu1 %v2302_v30 }
  0x99   : > { %610 = vmatmul.mubr.bf16.gmra.mxu0 %v311_v15  ;;  %803 = vmatmul.mubr.bf16.gmra.mxu1 %v311_v15 }
  0x9a   : > { %619 = vmatprep.mubr.bf16.mxu0 %v2462_v0  ;;  %812 = vmatprep.mubr.bf16.mxu1 %v2462_v0 }
  0xa1   : > { %620 = vmatmul.mubr.bf16.gmra.mxu0 %v312_v18  ;;  %813 = vmatmul.mubr.bf16.gmra.mxu1 %v312_v18 }
  0xa2   : > { %629 = vmatprep.mubr.bf16.mxu0 %v2462_v0  ;;  %822 = vmatprep.mubr.bf16.mxu1 %v2462_v0 }
  0xa9   : > { %630 = vmatmul.mubr.bf16.gmra.mxu0 %v313_v21  ;;  %823 = vmatmul.mubr.bf16.gmra.mxu1 %v313_v21 }
  0xaa   : > { %639 = vmatprep.mubr.bf16.mxu0 %v2462_v0  ;;  %832 = vmatprep.mubr.bf16.mxu1 %v2462_v0 }
  0xb1   : > { %640 = vmatmul.mubr.bf16.gmra.mxu0 %v314_v24  ;;  %833 = vmatmul.mubr.bf16.gmra.mxu1 %v314_v24 }
  0xb2   : > { %649 = vmatprep.mubr.bf16.mxu0 %v2462_v0  ;;  %842 = vmatprep.mubr.bf16.mxu1 %v2462_v0 }
  0xb9   : > { %650 = vmatmul.mubr.bf16.gmra.mxu0 %v315_v27  ;;  %843 = vmatmul.mubr.bf16.gmra.mxu1 %v315_v27 }
  0xba   : > { %659 = vmatprep.mubr.bf16.mxu0 %v2462_v0  ;;  %852 = vmatprep.mubr.bf16.mxu1 %v2462_v0 }
  0xc1   : > { %660 = vmatmul.mubr.bf16.gmra.mxu0 %v316_v31  ;;  %853 = vmatmul.mubr.bf16.gmra.mxu1 %v316_v31 }
  0xc2   : > { %669 = vmatprep.mubr.bf16.mxu0 %v2462_v0  ;;  %862 = vmatprep.mubr.bf16.mxu1 %v2462_v0 }
  0xc9   : > { %670 = vmatmul.mubr.bf16.gmra.mxu0 %v317_v34  ;;  %863 = vmatmul.mubr.bf16.gmra.mxu1 %v317_v34 }
  0xca   : > { %679 = vmatprep.mubr.bf16.mxu0 %v2462_v0  ;;  %872 = vmatprep.mubr.bf16.mxu1 %v2462_v0 }
  0xd1   : > { %680 = vmatmul.mubr.bf16.gmra.mxu0 %v318_v37  ;;  %873 = vmatmul.mubr.bf16.gmra.mxu1 %v318_v37 }
  0xd2   : > { %689 = vmatprep.mubr.bf16.mxu0 %v2462_v0  ;;  %882 = vmatprep.mubr.bf16.mxu1 %v2462_v0 }
  0xd9   : > { %690 = vmatmul.mubr.bf16.gmra.mxu0 %v319_v40  ;;  %883 = vmatmul.mubr.bf16.gmra.mxu1 %v319_v40 }
  0xda   : > { %699 = vmatprep.mubr.bf16.mxu0 %v2462_v0  ;;  %892 = vmatprep.mubr.bf16.mxu1 %v2462_v0 }
  0xe1   : > { %700 = vmatmul.mubr.bf16.gmra.mxu0 %v320_v43  ;;  %893 = vmatmul.mubr.bf16.gmra.mxu1 %v320_v43 }
  0xe2   : > { %709 = vmatprep.mubr.bf16.mxu0 %v2462_v0  ;;  %902 = vmatprep.mubr.bf16.mxu1 %v2462_v0 }
  0xe9   : > { %710 = vmatmul.mubr.bf16.gmra.mxu0 %v321_v46  ;;  %903 = vmatmul.mubr.bf16.gmra.mxu1 %v321_v46 }
  0xea   : > { %719 = vmatprep.mubr.bf16.mxu0 %v2462_v0  ;;  %912 = vmatprep.mubr.bf16.mxu1 %v2462_v0  ;;  %v2708_v0 = vrot.slane %v355_v56, %v371_v53 }
  0xf1   : > { %720 = vmatmul.mubr.bf16.gmra.mxu0 %v322_v49  ;;  %913 = vmatmul.mubr.bf16.gmra.mxu1 %v322_v49 }
 0x139   : > { %v571_v57 = vpop.f32.mrf.mxu0  ;;  %v764_v58 = vpop.f32.mrf.mxu1 }
 0x13a   : > { %v572_v7 = vadd.f32 %v571_v57, %v2710_v60  ;;  %v765_v8 = vadd.f32 %v764_v58, %v2712_v61 }
 0x13b   : > { %v573_v62 = vpop.f32.mrf.mxu0  ;;  %v766_v63 = vpop.f32.mrf.mxu1 }
 0x13c   : > { %v574_v3 = vadd.f32 %v573_v62, %v2706_v59  ;;  %v767_v4 = vadd.f32 %v766_v63, %v2708_v0  ;;  %v923_v21 = vmax.f32 %v572_v7, 0.0  ;;  %v925_v22 = vmax.f32 %v765_v8, 0.0 }
 0x13d   : > { %v575_v1 = vpop.f32.mrf.mxu0  ;;  %v768_v2 = vpop.f32.mrf.mxu1 }
 0x13e   : > { %v576_v5 = vadd.f32 %v575_v1, %v2710_v60  ;;  %v769_v6 = vadd.f32 %v768_v2, %v2712_v61  ;;  %v924_v17 = vmax.f32 %v574_v3, 0.0  ;;  %v926_v18 = vmax.f32 %v767_v4, 0.0 }
 0x13f   : > { %v577_v9 = vpop.f32.mrf.mxu0  ;;  %v770_v10 = vpop.f32.mrf.mxu1 }
 0x140   : > { %v578_v11 = vadd.f32 %v577_v9, %v2706_v59  ;;  %v771_v12 = vadd.f32 %v770_v10, %v2708_v0  ;;  %v927_v13 = vmax.f32 %v576_v5, 0.0  ;;  %v929_v14 = vmax.f32 %v769_v6, 0.0 }
 0x141   : > { %v581_v15 = vpop.f32.mrf.mxu0  ;;  %v774_v16 = vpop.f32.mrf.mxu1 }
 0x142   : > { %v928_v19 = vmax.f32 %v578_v11, 0.0  ;;  %v930_v20 = vmax.f32 %v771_v12, 0.0  ;;  %v1051_v27 = vpack.c.bf16 %v927_v13, %v923_v21  ;;  %v1053_v28 = vpack.c.bf16 %v929_v14, %v925_v22 }
 0x143   : > { %v583_v23 = vpop.f32.mrf.mxu0  ;;  %v776_v24 = vpop.f32.mrf.mxu1  ;;  %v582_v35 = vadd.f32 %v581_v15, %v2710_v60  ;;  %v775_v36 = vadd.f32 %v774_v16, %v2712_v61 }
 0x144   : > { %v1052_v25 = vpack.c.bf16 %v928_v19, %v924_v17  ;;  %v1054_v26 = vpack.c.bf16 %v930_v20, %v926_v18  ;;  %v584_v29 = vadd.f32 %v583_v23, %v2706_v59  ;;  %v777_v32 = vadd.f32 %v776_v24, %v2708_v0 }
 0x145   : > { %v585_v30 = vpop.f32.mrf.mxu0  ;;  %v778_v31 = vpop.f32.mrf.mxu1  ;;  %v931_v49 = vmax.f32 %v582_v35, 0.0  ;;  %v933_v50 = vmax.f32 %v775_v36, 0.0 }
 0x146   : > { %v586_v33 = vadd.f32 %v585_v30, %v2710_v60  ;;  %v779_v34 = vadd.f32 %v778_v31, %v2712_v61  ;;  %1410 = vmatprep.mubr.bf16.mxu0 %v1052_v25  ;;  %1571 = vmatprep.mubr.bf16.mxu1 %v1054_v26  ;;  %v932_v45 = vmax.f32 %v584_v29, 0.0  ;;  %v934_v46 = vmax.f32 %v777_v32, 0.0 }
 0x147   : > { %v587_v37 = vpop.f32.mrf.mxu0  ;;  %v780_v38 = vpop.f32.mrf.mxu1  ;;  %1411 = vmatmul.mubr.bf16.vlgmr.msra.gmra.mxu0 %v1051_v27  ;;  %1572 = vmatmul.mubr.bf16.vlgmr.msra.gmra.mxu1 %v1053_v28 }
 0x148   : > { %v588_v39 = vadd.f32 %v587_v37, %v2706_v59  ;;  %v781_v40 = vadd.f32 %v780_v38, %v2708_v0  ;;  %v935_v41 = vmax.f32 %v586_v33, 0.0  ;;  %v937_v42 = vmax.f32 %v779_v34, 0.0 }
 0x149   : > { %v591_v43 = vpop.f32.mrf.mxu0  ;;  %v784_v44 = vpop.f32.mrf.mxu1 }
 0x14a   : > { %v936_v47 = vmax.f32 %v588_v39, 0.0  ;;  %v938_v48 = vmax.f32 %v781_v40, 0.0  ;;  %v1055_v55 = vpack.c.bf16 %v935_v41, %v931_v49  ;;  %v1057_v56 = vpack.c.bf16 %v937_v42, %v933_v50 }
 0x14b   : > { %v593_v51 = vpop.f32.mrf.mxu0  ;;  %v786_v52 = vpop.f32.mrf.mxu1  ;;  %v592_v3 = vadd.f32 %v591_v43, %v2710_v60  ;;  %v785_v4 = vadd.f32 %v784_v44, %v2712_v61 }
 0x14c   : > { %v1056_v53 = vpack.c.bf16 %v936_v47, %v932_v45  ;;  %v1058_v54 = vpack.c.bf16 %v938_v48, %v934_v46  ;;  %v594_v57 = vadd.f32 %v593_v51, %v2706_v59  ;;  %v787_v63 = vadd.f32 %v786_v52, %v2708_v0 }
 0x14d   : > { %v595_v58 = vpop.f32.mrf.mxu0  ;;  %v788_v62 = vpop.f32.mrf.mxu1  ;;  %v939_v17 = vmax.f32 %v592_v3, 0.0  ;;  %v941_v18 = vmax.f32 %v785_v4, 0.0 }
 0x14e   : > { %v596_v1 = vadd.f32 %v595_v58, %v2710_v60  ;;  %v789_v2 = vadd.f32 %v788_v62, %v2712_v61  ;;  %1418 = vmatprep.mubr.bf16.mxu0 %v1056_v53  ;;  %1579 = vmatprep.mubr.bf16.mxu1 %v1058_v54  ;;  %v940_v13 = vmax.f32 %v594_v57, 0.0  ;;  %v942_v14 = vmax.f32 %v787_v63, 0.0 }
 0x14f   : > { %v597_v5 = vpop.f32.mrf.mxu0  ;;  %v790_v6 = vpop.f32.mrf.mxu1  ;;  %1419 = vmatmul.mubr.bf16.gmra.mxu0 %v1055_v55  ;;  %1580 = vmatmul.mubr.bf16.gmra.mxu1 %v1057_v56 }
 0x150   : > { %v598_v7 = vadd.f32 %v597_v5, %v2706_v59  ;;  %v791_v8 = vadd.f32 %v790_v6, %v2708_v0  ;;  %v943_v9 = vmax.f32 %v596_v1, 0.0  ;;  %v945_v10 = vmax.f32 %v789_v2, 0.0 }
 0x151   : > { %v601_v11 = vpop.f32.mrf.mxu0  ;;  %v794_v12 = vpop.f32.mrf.mxu1 }
 0x152   : > { %v944_v15 = vmax.f32 %v598_v7, 0.0  ;;  %v946_v16 = vmax.f32 %v791_v8, 0.0  ;;  %v1059_v23 = vpack.c.bf16 %v943_v9, %v939_v17  ;;  %v1061_v24 = vpack.c.bf16 %v945_v10, %v941_v18 }
 0x153   : > { %v603_v19 = vpop.f32.mrf.mxu0  ;;  %v796_v20 = vpop.f32.mrf.mxu1  ;;  %v602_v31 = vadd.f32 %v601_v11, %v2710_v60  ;;  %v795_v32 = vadd.f32 %v794_v12, %v2712_v61 }
 0x154   : > { %v1060_v21 = vpack.c.bf16 %v944_v15, %v940_v13  ;;  %v1062_v22 = vpack.c.bf16 %v946_v16, %v942_v14  ;;  %v604_v25 = vadd.f32 %v603_v19, %v2706_v59  ;;  %v797_v28 = vadd.f32 %v796_v20, %v2708_v0 }
 0x155   : > { %v605_v26 = vpop.f32.mrf.mxu0  ;;  %v798_v27 = vpop.f32.mrf.mxu1  ;;  %v947_v45 = vmax.f32 %v602_v31, 0.0  ;;  %v949_v46 = vmax.f32 %v795_v32, 0.0 }
 0x156   : > { %v606_v29 = vadd.f32 %v605_v26, %v2710_v60  ;;  %v799_v30 = vadd.f32 %v798_v27, %v2712_v61  ;;  %1426 = vmatprep.mubr.bf16.mxu0 %v1060_v21  ;;  %1587 = vmatprep.mubr.bf16.mxu1 %v1062_v22  ;;  %v948_v41 = vmax.f32 %v604_v25, 0.0  ;;  %v950_v42 = vmax.f32 %v797_v28, 0.0 }
 0x157   : > { %v607_v33 = vpop.f32.mrf.mxu0  ;;  %v800_v34 = vpop.f32.mrf.mxu1  ;;  %1427 = vmatmul.mubr.bf16.gmra.mxu0 %v1059_v23  ;;  %1588 = vmatmul.mubr.bf16.gmra.mxu1 %v1061_v24 }
 0x158   : > { %v608_v35 = vadd.f32 %v607_v33, %v2706_v59  ;;  %v801_v36 = vadd.f32 %v800_v34, %v2708_v0  ;;  %v951_v37 = vmax.f32 %v606_v29, 0.0  ;;  %v953_v38 = vmax.f32 %v799_v30, 0.0 }
 0x159   : > { %v611_v39 = vpop.f32.mrf.mxu0  ;;  %v804_v40 = vpop.f32.mrf.mxu1 }
 0x15a   : > { %v952_v43 = vmax.f32 %v608_v35, 0.0  ;;  %v954_v44 = vmax.f32 %v801_v36, 0.0  ;;  %v1063_v51 = vpack.c.bf16 %v951_v37, %v947_v45  ;;  %v1065_v52 = vpack.c.bf16 %v953_v38, %v949_v46 }
 0x15b   : > { %v613_v47 = vpop.f32.mrf.mxu0  ;;  %v806_v48 = vpop.f32.mrf.mxu1  ;;  %v612_v62 = vadd.f32 %v611_v39, %v2710_v60  ;;  %v805_v63 = vadd.f32 %v804_v40, %v2712_v61 }
 0x15c   : > { %v1064_v49 = vpack.c.bf16 %v952_v43, %v948_v41  ;;  %v1066_v50 = vpack.c.bf16 %v954_v44, %v950_v42  ;;  %v614_v53 = vadd.f32 %v613_v47, %v2706_v59  ;;  %v807_v56 = vadd.f32 %v806_v48, %v2708_v0 }
 0x15d   : > { %v615_v54 = vpop.f32.mrf.mxu0  ;;  %v808_v55 = vpop.f32.mrf.mxu1  ;;  %v955_v13 = vmax.f32 %v612_v62, 0.0  ;;  %v957_v14 = vmax.f32 %v805_v63, 0.0 }
 0x15e   : > { %v616_v57 = vadd.f32 %v615_v54, %v2710_v60  ;;  %v809_v58 = vadd.f32 %v808_v55, %v2712_v61  ;;  %1434 = vmatprep.mubr.bf16.mxu0 %v1064_v49  ;;  %1595 = vmatprep.mubr.bf16.mxu1 %v1066_v50  ;;  %v956_v9 = vmax.f32 %v614_v53, 0.0  ;;  %v958_v10 = vmax.f32 %v807_v56, 0.0 }
 0x15f   : > { %v617_v1 = vpop.f32.mrf.mxu0  ;;  %v810_v2 = vpop.f32.mrf.mxu1  ;;  %1435 = vmatmul.mubr.bf16.gmra.mxu0 %v1063_v51  ;;  %1596 = vmatmul.mubr.bf16.gmra.mxu1 %v1065_v52 }
 0x160   : > { %v618_v3 = vadd.f32 %v617_v1, %v2706_v59  ;;  %v811_v4 = vadd.f32 %v810_v2, %v2708_v0  ;;  %v959_v5 = vmax.f32 %v616_v57, 0.0  ;;  %v961_v6 = vmax.f32 %v809_v58, 0.0 }
 0x161   : > { %v621_v7 = vpop.f32.mrf.mxu0  ;;  %v814_v8 = vpop.f32.mrf.mxu1 }
 0x162   : > { %v960_v11 = vmax.f32 %v618_v3, 0.0  ;;  %v962_v12 = vmax.f32 %v811_v4, 0.0  ;;  %v1067_v19 = vpack.c.bf16 %v959_v5, %v955_v13  ;;  %v1069_v20 = vpack.c.bf16 %v961_v6, %v957_v14 }
 0x163   : > { %v623_v15 = vpop.f32.mrf.mxu0  ;;  %v816_v16 = vpop.f32.mrf.mxu1  ;;  %v622_v27 = vadd.f32 %v621_v7, %v2710_v60  ;;  %v815_v28 = vadd.f32 %v814_v8, %v2712_v61 }
 0x164   : > { %v1068_v17 = vpack.c.bf16 %v960_v11, %v956_v9  ;;  %v1070_v18 = vpack.c.bf16 %v962_v12, %v958_v10  ;;  %v624_v21 = vadd.f32 %v623_v15, %v2706_v59  ;;  %v817_v24 = vadd.f32 %v816_v16, %v2708_v0 }
 0x165   : > { %v625_v22 = vpop.f32.mrf.mxu0  ;;  %v818_v23 = vpop.f32.mrf.mxu1  ;;  %v963_v41 = vmax.f32 %v622_v27, 0.0  ;;  %v965_v42 = vmax.f32 %v815_v28, 0.0 }
 0x166   : > { %v626_v25 = vadd.f32 %v625_v22, %v2710_v60  ;;  %v819_v26 = vadd.f32 %v818_v23, %v2712_v61  ;;  %1442 = vmatprep.mubr.bf16.mxu0 %v1068_v17  ;;  %1603 = vmatprep.mubr.bf16.mxu1 %v1070_v18  ;;  %v964_v37 = vmax.f32 %v624_v21, 0.0  ;;  %v966_v38 = vmax.f32 %v817_v24, 0.0 }
 0x167   : > { %v627_v29 = vpop.f32.mrf.mxu0  ;;  %v820_v30 = vpop.f32.mrf.mxu1  ;;  %1443 = vmatmul.mubr.bf16.gmra.mxu0 %v1067_v19  ;;  %1604 = vmatmul.mubr.bf16.gmra.mxu1 %v1069_v20 }
 0x168   : > { %v628_v31 = vadd.f32 %v627_v29, %v2706_v59  ;;  %v821_v32 = vadd.f32 %v820_v30, %v2708_v0  ;;  %v967_v33 = vmax.f32 %v626_v25, 0.0  ;;  %v969_v34 = vmax.f32 %v819_v26, 0.0 }
 0x169   : > { %v631_v35 = vpop.f32.mrf.mxu0  ;;  %v824_v36 = vpop.f32.mrf.mxu1 }
 0x16a   : > { %v968_v39 = vmax.f32 %v628_v31, 0.0  ;;  %v970_v40 = vmax.f32 %v821_v32, 0.0  ;;  %v1071_v47 = vpack.c.bf16 %v967_v33, %v963_v41  ;;  %v1073_v48 = vpack.c.bf16 %v969_v34, %v965_v42 }
 0x16b   : > { %v633_v43 = vpop.f32.mrf.mxu0  ;;  %v826_v44 = vpop.f32.mrf.mxu1  ;;  %v632_v55 = vadd.f32 %v631_v35, %v2710_v60  ;;  %v825_v56 = vadd.f32 %v824_v36, %v2712_v61 }
 0x16c   : > { %v1072_v45 = vpack.c.bf16 %v968_v39, %v964_v37  ;;  %v1074_v46 = vpack.c.bf16 %v970_v40, %v966_v38  ;;  %v634_v49 = vadd.f32 %v633_v43, %v2706_v59  ;;  %v827_v52 = vadd.f32 %v826_v44, %v2708_v0 }
 0x16d   : > { %v635_v50 = vpop.f32.mrf.mxu0  ;;  %v828_v51 = vpop.f32.mrf.mxu1  ;;  %v971_v9 = vmax.f32 %v632_v55, 0.0  ;;  %v973_v10 = vmax.f32 %v825_v56, 0.0 }
 0x16e   : > { %v636_v53 = vadd.f32 %v635_v50, %v2710_v60  ;;  %v829_v54 = vadd.f32 %v828_v51, %v2712_v61  ;;  %1450 = vmatprep.mubr.bf16.mxu0 %v1072_v45  ;;  %1611 = vmatprep.mubr.bf16.mxu1 %v1074_v46  ;;  %v972_v5 = vmax.f32 %v634_v49, 0.0  ;;  %v974_v6 = vmax.f32 %v827_v52, 0.0 }
 0x16f   : > { %v637_v57 = vpop.f32.mrf.mxu0  ;;  %v830_v58 = vpop.f32.mrf.mxu1  ;;  %1451 = vmatmul.mubr.bf16.gmra.mxu0 %v1071_v47  ;;  %1612 = vmatmul.mubr.bf16.gmra.mxu1 %v1073_v48 }
 0x170   : > { %v638_v62 = vadd.f32 %v637_v57, %v2706_v59  ;;  %v831_v63 = vadd.f32 %v830_v58, %v2708_v0  ;;  %v975_v1 = vmax.f32 %v636_v53, 0.0  ;;  %v977_v2 = vmax.f32 %v829_v54, 0.0 }
 0x171   : > { %v641_v3 = vpop.f32.mrf.mxu0  ;;  %v834_v4 = vpop.f32.mrf.mxu1 }
 0x172   : > { %v976_v7 = vmax.f32 %v638_v62, 0.0  ;;  %v978_v8 = vmax.f32 %v831_v63, 0.0  ;;  %v1075_v15 = vpack.c.bf16 %v975_v1, %v971_v9  ;;  %v1077_v16 = vpack.c.bf16 %v977_v2, %v973_v10 }
 0x173   : > { %v643_v11 = vpop.f32.mrf.mxu0  ;;  %v836_v12 = vpop.f32.mrf.mxu1  ;;  %v642_v23 = vadd.f32 %v641_v3, %v2710_v60  ;;  %v835_v24 = vadd.f32 %v834_v4, %v2712_v61 }
 0x174   : > { %v1076_v13 = vpack.c.bf16 %v976_v7, %v972_v5  ;;  %v1078_v14 = vpack.c.bf16 %v978_v8, %v974_v6  ;;  %v644_v17 = vadd.f32 %v643_v11, %v2706_v59  ;;  %v837_v20 = vadd.f32 %v836_v12, %v2708_v0 }
 0x175   : > { %v645_v18 = vpop.f32.mrf.mxu0  ;;  %v838_v19 = vpop.f32.mrf.mxu1  ;;  %v979_v37 = vmax.f32 %v642_v23, 0.0  ;;  %v981_v38 = vmax.f32 %v835_v24, 0.0 }
 0x176   : > { %v646_v21 = vadd.f32 %v645_v18, %v2710_v60  ;;  %v839_v22 = vadd.f32 %v838_v19, %v2712_v61  ;;  %1458 = vmatprep.mubr.bf16.mxu0 %v1076_v13  ;;  %1619 = vmatprep.mubr.bf16.mxu1 %v1078_v14  ;;  %v980_v33 = vmax.f32 %v644_v17, 0.0  ;;  %v982_v34 = vmax.f32 %v837_v20, 0.0 }
 0x177   : > { %v647_v25 = vpop.f32.mrf.mxu0  ;;  %v840_v26 = vpop.f32.mrf.mxu1  ;;  %1459 = vmatmul.mubr.bf16.gmra.mxu0 %v1075_v15  ;;  %1620 = vmatmul.mubr.bf16.gmra.mxu1 %v1077_v16 }
 0x178   : > { %v648_v27 = vadd.f32 %v647_v25, %v2706_v59  ;;  %v841_v28 = vadd.f32 %v840_v26, %v2708_v0  ;;  %v983_v29 = vmax.f32 %v646_v21, 0.0  ;;  %v985_v30 = vmax.f32 %v839_v22, 0.0 }
 0x179   : > { %v651_v31 = vpop.f32.mrf.mxu0  ;;  %v844_v32 = vpop.f32.mrf.mxu1 }
 0x17a   : > { %v984_v35 = vmax.f32 %v648_v27, 0.0  ;;  %v986_v36 = vmax.f32 %v841_v28, 0.0  ;;  %v1079_v43 = vpack.c.bf16 %v983_v29, %v979_v37  ;;  %v1081_v44 = vpack.c.bf16 %v985_v30, %v981_v38 }
 0x17b   : > { %v653_v39 = vpop.f32.mrf.mxu0  ;;  %v846_v40 = vpop.f32.mrf.mxu1  ;;  %v652_v51 = vadd.f32 %v651_v31, %v2710_v60  ;;  %v845_v52 = vadd.f32 %v844_v32, %v2712_v61 }
 0x17c   : > { %v1080_v41 = vpack.c.bf16 %v984_v35, %v980_v33  ;;  %v1082_v42 = vpack.c.bf16 %v986_v36, %v982_v34  ;;  %v654_v45 = vadd.f32 %v653_v39, %v2706_v59  ;;  %v847_v48 = vadd.f32 %v846_v40, %v2708_v0 }
 0x17d   : > { %v655_v46 = vpop.f32.mrf.mxu0  ;;  %v848_v47 = vpop.f32.mrf.mxu1  ;;  %v987_v5 = vmax.f32 %v652_v51, 0.0  ;;  %v989_v6 = vmax.f32 %v845_v52, 0.0 }
 0x17e   : > { %v656_v49 = vadd.f32 %v655_v46, %v2710_v60  ;;  %v849_v50 = vadd.f32 %v848_v47, %v2712_v61  ;;  %1466 = vmatprep.mubr.bf16.mxu0 %v1080_v41  ;;  %1627 = vmatprep.mubr.bf16.mxu1 %v1082_v42  ;;  %v988_v1 = vmax.f32 %v654_v45, 0.0  ;;  %v990_v2 = vmax.f32 %v847_v48, 0.0 }
 0x17f   : > { %v657_v53 = vpop.f32.mrf.mxu0  ;;  %v850_v54 = vpop.f32.mrf.mxu1  ;;  %1467 = vmatmul.mubr.bf16.gmra.mxu0 %v1079_v43  ;;  %1628 = vmatmul.mubr.bf16.gmra.mxu1 %v1081_v44 }
 0x180   : > { %v658_v55 = vadd.f32 %v657_v53, %v2706_v59  ;;  %v851_v56 = vadd.f32 %v850_v54, %v2708_v0  ;;  %v991_v57 = vmax.f32 %v656_v49, 0.0  ;;  %v993_v58 = vmax.f32 %v849_v50, 0.0 }
 0x181   : > { %v661_v62 = vpop.f32.mrf.mxu0  ;;  %v854_v63 = vpop.f32.mrf.mxu1 }
 0x182   : > { %v992_v3 = vmax.f32 %v658_v55, 0.0  ;;  %v994_v4 = vmax.f32 %v851_v56, 0.0  ;;  %v1083_v11 = vpack.c.bf16 %v991_v57, %v987_v5  ;;  %v1085_v12 = vpack.c.bf16 %v993_v58, %v989_v6 }
 0x183   : > { %v663_v7 = vpop.f32.mrf.mxu0  ;;  %v856_v8 = vpop.f32.mrf.mxu1  ;;  %v662_v19 = vadd.f32 %v661_v62, %v2710_v60  ;;  %v855_v20 = vadd.f32 %v854_v63, %v2712_v61 }
 0x184   : > { %v1084_v9 = vpack.c.bf16 %v992_v3, %v988_v1  ;;  %v1086_v10 = vpack.c.bf16 %v994_v4, %v990_v2  ;;  %v664_v13 = vadd.f32 %v663_v7, %v2706_v59  ;;  %v857_v16 = vadd.f32 %v856_v8, %v2708_v0 }
 0x185   : > { %v665_v14 = vpop.f32.mrf.mxu0  ;;  %v858_v15 = vpop.f32.mrf.mxu1  ;;  %v995_v33 = vmax.f32 %v662_v19, 0.0  ;;  %v997_v34 = vmax.f32 %v855_v20, 0.0 }
 0x186   : > { %v666_v17 = vadd.f32 %v665_v14, %v2710_v60  ;;  %v859_v18 = vadd.f32 %v858_v15, %v2712_v61  ;;  %1474 = vmatprep.mubr.bf16.mxu0 %v1084_v9  ;;  %1635 = vmatprep.mubr.bf16.mxu1 %v1086_v10  ;;  %v996_v29 = vmax.f32 %v664_v13, 0.0  ;;  %v998_v30 = vmax.f32 %v857_v16, 0.0 }
 0x187   : > { %v667_v21 = vpop.f32.mrf.mxu0  ;;  %v860_v22 = vpop.f32.mrf.mxu1  ;;  %1475 = vmatmul.mubr.bf16.gmra.mxu0 %v1083_v11  ;;  %1636 = vmatmul.mubr.bf16.gmra.mxu1 %v1085_v12 }
 0x188   : > { %v668_v23 = vadd.f32 %v667_v21, %v2706_v59  ;;  %v861_v24 = vadd.f32 %v860_v22, %v2708_v0  ;;  %v999_v25 = vmax.f32 %v666_v17, 0.0  ;;  %v1001_v26 = vmax.f32 %v859_v18, 0.0 }
 0x189   : > { %v671_v27 = vpop.f32.mrf.mxu0  ;;  %v864_v28 = vpop.f32.mrf.mxu1 }
 0x18a   : > { %v1000_v31 = vmax.f32 %v668_v23, 0.0  ;;  %v1002_v32 = vmax.f32 %v861_v24, 0.0  ;;  %v1087_v39 = vpack.c.bf16 %v999_v25, %v995_v33  ;;  %v1089_v40 = vpack.c.bf16 %v1001_v26, %v997_v34 }
 0x18b   : > { %v673_v35 = vpop.f32.mrf.mxu0  ;;  %v866_v36 = vpop.f32.mrf.mxu1  ;;  %v672_v47 = vadd.f32 %v671_v27, %v2710_v60  ;;  %v865_v48 = vadd.f32 %v864_v28, %v2712_v61 }
 0x18c   : > { %v1088_v37 = vpack.c.bf16 %v1000_v31, %v996_v29  ;;  %v1090_v38 = vpack.c.bf16 %v1002_v32, %v998_v30  ;;  %v674_v41 = vadd.f32 %v673_v35, %v2706_v59  ;;  %v867_v44 = vadd.f32 %v866_v36, %v2708_v0 }
 0x18d   : > { %v675_v42 = vpop.f32.mrf.mxu0  ;;  %v868_v43 = vpop.f32.mrf.mxu1  ;;  %v1003_v1 = vmax.f32 %v672_v47, 0.0  ;;  %v1005_v2 = vmax.f32 %v865_v48, 0.0 }
 0x18e   : > { %v676_v45 = vadd.f32 %v675_v42, %v2710_v60  ;;  %v869_v46 = vadd.f32 %v868_v43, %v2712_v61  ;;  %1482 = vmatprep.mubr.bf16.mxu0 %v1088_v37  ;;  %1643 = vmatprep.mubr.bf16.mxu1 %v1090_v38  ;;  %v1004_v57 = vmax.f32 %v674_v41, 0.0  ;;  %v1006_v58 = vmax.f32 %v867_v44, 0.0 }
 0x18f   : > { %v677_v49 = vpop.f32.mrf.mxu0  ;;  %v870_v50 = vpop.f32.mrf.mxu1  ;;  %1483 = vmatmul.mubr.bf16.gmra.mxu0 %v1087_v39  ;;  %1644 = vmatmul.mubr.bf16.gmra.mxu1 %v1089_v40 }
 0x190   : > { %v678_v51 = vadd.f32 %v677_v49, %v2706_v59  ;;  %v871_v52 = vadd.f32 %v870_v50, %v2708_v0  ;;  %v1007_v53 = vmax.f32 %v676_v45, 0.0  ;;  %v1009_v54 = vmax.f32 %v869_v46, 0.0 }
 0x191   : > { %v681_v55 = vpop.f32.mrf.mxu0  ;;  %v874_v56 = vpop.f32.mrf.mxu1 }
 0x192   : > { %v1008_v62 = vmax.f32 %v678_v51, 0.0  ;;  %v1010_v63 = vmax.f32 %v871_v52, 0.0  ;;  %v1091_v7 = vpack.c.bf16 %v1007_v53, %v1003_v1  ;;  %v1093_v8 = vpack.c.bf16 %v1009_v54, %v1005_v2 }
 0x193   : > { %v683_v3 = vpop.f32.mrf.mxu0  ;;  %v876_v4 = vpop.f32.mrf.mxu1  ;;  %v682_v15 = vadd.f32 %v681_v55, %v2710_v60  ;;  %v875_v16 = vadd.f32 %v874_v56, %v2712_v61 }
 0x194   : > { %v1092_v5 = vpack.c.bf16 %v1008_v62, %v1004_v57  ;;  %v1094_v6 = vpack.c.bf16 %v1010_v63, %v1006_v58  ;;  %v684_v9 = vadd.f32 %v683_v3, %v2706_v59  ;;  %v877_v12 = vadd.f32 %v876_v4, %v2708_v0 }
 0x195   : > { %v685_v10 = vpop.f32.mrf.mxu0  ;;  %v878_v11 = vpop.f32.mrf.mxu1  ;;  %v1011_v29 = vmax.f32 %v682_v15, 0.0  ;;  %v1013_v30 = vmax.f32 %v875_v16, 0.0 }
 0x196   : > { %v686_v13 = vadd.f32 %v685_v10, %v2710_v60  ;;  %v879_v14 = vadd.f32 %v878_v11, %v2712_v61  ;;  %1490 = vmatprep.mubr.bf16.mxu0 %v1092_v5  ;;  %1651 = vmatprep.mubr.bf16.mxu1 %v1094_v6  ;;  %v1012_v25 = vmax.f32 %v684_v9, 0.0  ;;  %v1014_v26 = vmax.f32 %v877_v12, 0.0 }
 0x197   : > { %v687_v17 = vpop.f32.mrf.mxu0  ;;  %v880_v18 = vpop.f32.mrf.mxu1  ;;  %1491 = vmatmul.mubr.bf16.gmra.mxu0 %v1091_v7  ;;  %1652 = vmatmul.mubr.bf16.gmra.mxu1 %v1093_v8 }
 0x198   : > { %v688_v19 = vadd.f32 %v687_v17, %v2706_v59  ;;  %v881_v20 = vadd.f32 %v880_v18, %v2708_v0  ;;  %v1015_v21 = vmax.f32 %v686_v13, 0.0  ;;  %v1017_v22 = vmax.f32 %v879_v14, 0.0 }
 0x199   : > { %v691_v23 = vpop.f32.mrf.mxu0  ;;  %v884_v24 = vpop.f32.mrf.mxu1 }
 0x19a   : > { %v1016_v27 = vmax.f32 %v688_v19, 0.0  ;;  %v1018_v28 = vmax.f32 %v881_v20, 0.0  ;;  %v1095_v35 = vpack.c.bf16 %v1015_v21, %v1011_v29  ;;  %v1097_v36 = vpack.c.bf16 %v1017_v22, %v1013_v30 }
 0x19b   : > { %v693_v31 = vpop.f32.mrf.mxu0  ;;  %v886_v32 = vpop.f32.mrf.mxu1  ;;  %v692_v43 = vadd.f32 %v691_v23, %v2710_v60  ;;  %v885_v44 = vadd.f32 %v884_v24, %v2712_v61 }
 0x19c   : > { %v1096_v33 = vpack.c.bf16 %v1016_v27, %v1012_v25  ;;  %v1098_v34 = vpack.c.bf16 %v1018_v28, %v1014_v26  ;;  %v694_v37 = vadd.f32 %v693_v31, %v2706_v59  ;;  %v887_v40 = vadd.f32 %v886_v32, %v2708_v0 }
 0x19d   : > { %v695_v38 = vpop.f32.mrf.mxu0  ;;  %v888_v39 = vpop.f32.mrf.mxu1  ;;  %v1019_v57 = vmax.f32 %v692_v43, 0.0  ;;  %v1021_v58 = vmax.f32 %v885_v44, 0.0 }
 0x19e   : > { %v696_v41 = vadd.f32 %v695_v38, %v2710_v60  ;;  %v889_v42 = vadd.f32 %v888_v39, %v2712_v61  ;;  %1498 = vmatprep.mubr.bf16.mxu0 %v1096_v33  ;;  %1659 = vmatprep.mubr.bf16.mxu1 %v1098_v34  ;;  %v1020_v53 = vmax.f32 %v694_v37, 0.0  ;;  %v1022_v54 = vmax.f32 %v887_v40, 0.0 }
 0x19f   : > { %v697_v45 = vpop.f32.mrf.mxu0  ;;  %v890_v46 = vpop.f32.mrf.mxu1  ;;  %1499 = vmatmul.mubr.bf16.gmra.mxu0 %v1095_v35  ;;  %1660 = vmatmul.mubr.bf16.gmra.mxu1 %v1097_v36 }
 0x1a0   : > { %v698_v47 = vadd.f32 %v697_v45, %v2706_v59  ;;  %v891_v48 = vadd.f32 %v890_v46, %v2708_v0  ;;  %v1023_v49 = vmax.f32 %v696_v41, 0.0  ;;  %v1025_v50 = vmax.f32 %v889_v42, 0.0 }
 0x1a1   : > { %v701_v51 = vpop.f32.mrf.mxu0  ;;  %v894_v52 = vpop.f32.mrf.mxu1 }
 0x1a2   : > { %v1024_v55 = vmax.f32 %v698_v47, 0.0  ;;  %v1026_v56 = vmax.f32 %v891_v48, 0.0  ;;  %v1099_v3 = vpack.c.bf16 %v1023_v49, %v1019_v57  ;;  %v1101_v4 = vpack.c.bf16 %v1025_v50, %v1021_v58 }
 0x1a3   : > { %v703_v62 = vpop.f32.mrf.mxu0  ;;  %v896_v63 = vpop.f32.mrf.mxu1  ;;  %v702_v11 = vadd.f32 %v701_v51, %v2710_v60  ;;  %v895_v12 = vadd.f32 %v894_v52, %v2712_v61 }
 0x1a4   : > { %v1100_v1 = vpack.c.bf16 %v1024_v55, %v1020_v53  ;;  %v1102_v2 = vpack.c.bf16 %v1026_v56, %v1022_v54  ;;  %v704_v5 = vadd.f32 %v703_v62, %v2706_v59  ;;  %v897_v8 = vadd.f32 %v896_v63, %v2708_v0 }
 0x1a5   : > { %v705_v6 = vpop.f32.mrf.mxu0  ;;  %v898_v7 = vpop.f32.mrf.mxu1  ;;  %v1027_v25 = vmax.f32 %v702_v11, 0.0  ;;  %v1029_v26 = vmax.f32 %v895_v12, 0.0 }
 0x1a6   : > { %v706_v9 = vadd.f32 %v705_v6, %v2710_v60  ;;  %v899_v10 = vadd.f32 %v898_v7, %v2712_v61  ;;  %1506 = vmatprep.mubr.bf16.mxu0 %v1100_v1  ;;  %1667 = vmatprep.mubr.bf16.mxu1 %v1102_v2  ;;  %v1028_v21 = vmax.f32 %v704_v5, 0.0  ;;  %v1030_v22 = vmax.f32 %v897_v8, 0.0 }
 0x1a7   : > { %v707_v13 = vpop.f32.mrf.mxu0  ;;  %v900_v14 = vpop.f32.mrf.mxu1  ;;  %1507 = vmatmul.mubr.bf16.gmra.mxu0 %v1099_v3  ;;  %1668 = vmatmul.mubr.bf16.gmra.mxu1 %v1101_v4 }
 0x1a8   : > { %v708_v15 = vadd.f32 %v707_v13, %v2706_v59  ;;  %v901_v16 = vadd.f32 %v900_v14, %v2708_v0  ;;  %v1031_v17 = vmax.f32 %v706_v9, 0.0  ;;  %v1033_v18 = vmax.f32 %v899_v10, 0.0 }
 0x1a9   : > { %v711_v19 = vpop.f32.mrf.mxu0  ;;  %v904_v20 = vpop.f32.mrf.mxu1 }
 0x1aa   : > { %v1032_v23 = vmax.f32 %v708_v15, 0.0  ;;  %v1034_v24 = vmax.f32 %v901_v16, 0.0  ;;  %v1103_v31 = vpack.c.bf16 %v1031_v17, %v1027_v25  ;;  %v1105_v32 = vpack.c.bf16 %v1033_v18, %v1029_v26 }
 0x1ab   : > { %v713_v27 = vpop.f32.mrf.mxu0  ;;  %v906_v28 = vpop.f32.mrf.mxu1  ;;  %v712_v39 = vadd.f32 %v711_v19, %v2710_v60  ;;  %v905_v40 = vadd.f32 %v904_v20, %v2712_v61 }
 0x1ac   : > { %v1104_v29 = vpack.c.bf16 %v1032_v23, %v1028_v21  ;;  %v1106_v30 = vpack.c.bf16 %v1034_v24, %v1030_v22  ;;  %v714_v33 = vadd.f32 %v713_v27, %v2706_v59  ;;  %v907_v36 = vadd.f32 %v906_v28, %v2708_v0 }
 0x1ad   : > { %v715_v34 = vpop.f32.mrf.mxu0  ;;  %v908_v35 = vpop.f32.mrf.mxu1  ;;  %v1035_v53 = vmax.f32 %v712_v39, 0.0  ;;  %v1037_v54 = vmax.f32 %v905_v40, 0.0 }
 0x1ae   : > { %v716_v37 = vadd.f32 %v715_v34, %v2710_v60  ;;  %v909_v38 = vadd.f32 %v908_v35, %v2712_v61  ;;  %1514 = vmatprep.mubr.bf16.mxu0 %v1104_v29  ;;  %1675 = vmatprep.mubr.bf16.mxu1 %v1106_v30  ;;  %v1036_v49 = vmax.f32 %v714_v33, 0.0  ;;  %v1038_v50 = vmax.f32 %v907_v36, 0.0 }
 0x1af   : > { %v717_v41 = vpop.f32.mrf.mxu0  ;;  %v910_v42 = vpop.f32.mrf.mxu1  ;;  %1515 = vmatmul.mubr.bf16.gmra.mxu0 %v1103_v31  ;;  %1676 = vmatmul.mubr.bf16.gmra.mxu1 %v1105_v32 }
 0x1b0   : > { %v718_v43 = vadd.f32 %v717_v41, %v2706_v59  ;;  %v911_v44 = vadd.f32 %v910_v42, %v2708_v0  ;;  %v1039_v45 = vmax.f32 %v716_v37, 0.0  ;;  %v1041_v46 = vmax.f32 %v909_v38, 0.0 }
 0x1b1   : > { %v721_v47 = vpop.f32.mrf.mxu0  ;;  %v914_v48 = vpop.f32.mrf.mxu1 }
 0x1b2   : > { %v1040_v51 = vmax.f32 %v718_v43, 0.0  ;;  %v1042_v52 = vmax.f32 %v911_v44, 0.0  ;;  %v1107_v62 = vpack.c.bf16 %v1039_v45, %v1035_v53  ;;  %v1109_v63 = vpack.c.bf16 %v1041_v46, %v1037_v54 }
 0x1b3   : > { %v723_v55 = vpop.f32.mrf.mxu0  ;;  %v916_v56 = vpop.f32.mrf.mxu1  ;;  %v722_v7 = vadd.f32 %v721_v47, %v2710_v60  ;;  %v915_v8 = vadd.f32 %v914_v48, %v2712_v61 }
 0x1b4   : > { %v1108_v57 = vpack.c.bf16 %v1040_v51, %v1036_v49  ;;  %v1110_v58 = vpack.c.bf16 %v1042_v52, %v1038_v50  ;;  %v724_v1 = vadd.f32 %v723_v55, %v2706_v59  ;;  %v917_v4 = vadd.f32 %v916_v56, %v2708_v0 }
 0x1b5   : > { %v725_v2 = vpop.f32.mrf.mxu0  ;;  %v918_v3 = vpop.f32.mrf.mxu1  ;;  %v1043_v19 = vmax.f32 %v722_v7, 0.0  ;;  %v1045_v20 = vmax.f32 %v915_v8, 0.0 }
 0x1b6   : > { %v726_v5 = vadd.f32 %v725_v2, %v2710_v60  ;;  %v919_v6 = vadd.f32 %v918_v3, %v2712_v61  ;;  %1522 = vmatprep.mubr.bf16.mxu0 %v1108_v57  ;;  %1683 = vmatprep.mubr.bf16.mxu1 %v1110_v58  ;;  %v1044_v15 = vmax.f32 %v724_v1, 0.0  ;;  %v1046_v16 = vmax.f32 %v917_v4, 0.0 }
 0x1b7   : > { %v727_v9 = vpop.f32.mrf.mxu0  ;;  %v920_v10 = vpop.f32.mrf.mxu1  ;;  %1523 = vmatmul.mubr.bf16.gmra.mxu0 %v1107_v62  ;;  %1684 = vmatmul.mubr.bf16.gmra.mxu1 %v1109_v63 }
 0x1b8   : > { %v728_v11 = vadd.f32 %v727_v9, %v2706_v59  ;;  %v921_v12 = vadd.f32 %v920_v10, %v2708_v0  ;;  %v1047_v13 = vmax.f32 %v726_v5, 0.0  ;;  %v1049_v14 = vmax.f32 %v919_v6, 0.0  ;;  %v2845_v0 = vld [vmem:[%s2969_s4] ss:$0 sm:$0xff] }
 0x1ba   : > { %v1048_v17 = vmax.f32 %v728_v11, 0.0  ;;  %v1050_v18 = vmax.f32 %v921_v12, 0.0  ;;  %v1111_v22 = vpack.c.bf16 %v1047_v13, %v1043_v19  ;;  %v1113_v61 = vpack.c.bf16 %v1049_v14, %v1045_v20 }
 0x1bc   : > { %v1112_v21 = vpack.c.bf16 %v1048_v17, %v1044_v15  ;;  %v1114_v60 = vpack.c.bf16 %v1050_v18, %v1046_v16 }
 0x1be   : > { %1530 = vmatprep.mubr.bf16.mxu0 %v1112_v21  ;;  %1691 = vmatprep.mubr.bf16.mxu1 %v1114_v60 }
 0x1bf   : > { %1531 = vmatmul.mubr.bf16.gmra.mxu0 %v1111_v22  ;;  %1692 = vmatmul.mubr.bf16.gmra.mxu1 %v1113_v61 }
 0x207   : > { %v1939_v23 = vpop.f32.mrf.mxu0  ;;  %v2051_v59 = vpop.f32.mrf.mxu1 }
 0x209   : > { %v1940_v24 = vpop.f32.mrf.mxu0  ;;  %v2052_v25 = vpop.f32.mrf.mxu1 }
 0x20a   : > { %v1941_v26 = vadd.f32 %v1940_v24, %v1939_v23  ;;  %v2053_v30 = vadd.f32 %v2052_v25, %v2051_v59 }
 0x20b   : > { %v1942_v27 = vpop.f32.mrf.mxu0  ;;  %v2054_v28 = vpop.f32.mrf.mxu1 }
 0x20c   : > { %v1413_v29 = vadd.f32 %v1941_v26, %v2845_v0 }
 0x20d   : > { %v1943_v31 = vpop.f32.mrf.mxu0  ;;  %v2055_v32 = vpop.f32.mrf.mxu1 }
 0x20e   : > { %v1574_v33 = vadd.f32 %v2053_v30, %v1413_v29  ;;  %v1944_v34 = vadd.f32 %v1943_v31, %v1942_v27  ;;  %v2056_v38 = vadd.f32 %v2055_v32, %v2054_v28 }
 0x20f   : > { %v1945_v35 = vpop.f32.mrf.mxu0  ;;  %v2057_v36 = vpop.f32.mrf.mxu1 }
 0x210   : > { %1700 = vst [vmem:[%s2850_s13] sm:$0xff] %v1574_v33  ;;  %v1416_v37 = vadd.f32 %v1944_v34, %v2845_v0 }
 0x211   : > { %v1946_v39 = vpop.f32.mrf.mxu0  ;;  %v2058_v40 = vpop.f32.mrf.mxu1 }
 0x212   : > { %v1577_v41 = vadd.f32 %v2056_v38, %v1416_v37  ;;  %v1947_v42 = vadd.f32 %v1946_v39, %v1945_v35  ;;  %v2059_v46 = vadd.f32 %v2058_v40, %v2057_v36 }
 0x213   : > { %v1948_v43 = vpop.f32.mrf.mxu0  ;;  %v2060_v44 = vpop.f32.mrf.mxu1 }
 0x214   : > { %1701 = vst [vmem:[%s2850_s13 + $0x8] sm:$0xff] %v1577_v41  ;;  %v1421_v45 = vadd.f32 %v1947_v42, %v2845_v0 }
 0x215   : > { %v1949_v47 = vpop.f32.mrf.mxu0  ;;  %v2061_v48 = vpop.f32.mrf.mxu1 }
 0x216   : > { %v1582_v49 = vadd.f32 %v2059_v46, %v1421_v45  ;;  %v1950_v50 = vadd.f32 %v1949_v47, %v1948_v43  ;;  %v2062_v54 = vadd.f32 %v2061_v48, %v2060_v44 }
 0x217   : > { %v1951_v51 = vpop.f32.mrf.mxu0  ;;  %v2063_v52 = vpop.f32.mrf.mxu1 }
 0x218   : > { %1702 = vst [vmem:[%s2850_s13 + $0x10] sm:$0xff] %v1582_v49  ;;  %v1424_v53 = vadd.f32 %v1950_v50, %v2845_v0 }
 0x219   : > { %v1952_v55 = vpop.f32.mrf.mxu0  ;;  %v2064_v56 = vpop.f32.mrf.mxu1 }
 0x21a   : > { %v1585_v57 = vadd.f32 %v2062_v54, %v1424_v53  ;;  %v1953_v58 = vadd.f32 %v1952_v55, %v1951_v51  ;;  %v2065_v2 = vadd.f32 %v2064_v56, %v2063_v52 }
 0x21b   : > { %v1954_v62 = vpop.f32.mrf.mxu0  ;;  %v2066_v63 = vpop.f32.mrf.mxu1 }
 0x21c   : > { %1703 = vst [vmem:[%s2850_s13 + $0x18] sm:$0xff] %v1585_v57  ;;  %v1429_v1 = vadd.f32 %v1953_v58, %v2845_v0 }
 0x21d   : > { %v1955_v3 = vpop.f32.mrf.mxu0  ;;  %v2067_v4 = vpop.f32.mrf.mxu1 }
 0x21e   : > { %v1590_v5 = vadd.f32 %v2065_v2, %v1429_v1  ;;  %v1956_v6 = vadd.f32 %v1955_v3, %v1954_v62  ;;  %v2068_v10 = vadd.f32 %v2067_v4, %v2066_v63 }
 0x21f   : > { %v1957_v7 = vpop.f32.mrf.mxu0  ;;  %v2069_v8 = vpop.f32.mrf.mxu1 }
 0x220   : > { %1704 = vst [vmem:[%s2850_s13 + $0x20] sm:$0xff] %v1590_v5  ;;  %v1432_v9 = vadd.f32 %v1956_v6, %v2845_v0 }
 0x221   : > { %v1958_v11 = vpop.f32.mrf.mxu0  ;;  %v2070_v12 = vpop.f32.mrf.mxu1 }
 0x222   : > { %v1593_v13 = vadd.f32 %v2068_v10, %v1432_v9  ;;  %v1959_v14 = vadd.f32 %v1958_v11, %v1957_v7  ;;  %v2071_v18 = vadd.f32 %v2070_v12, %v2069_v8 }
 0x223   : > { %v1960_v15 = vpop.f32.mrf.mxu0  ;;  %v2072_v16 = vpop.f32.mrf.mxu1 }
 0x224   : > { %1705 = vst [vmem:[%s2850_s13 + $0x28] sm:$0xff] %v1593_v13  ;;  %v1437_v17 = vadd.f32 %v1959_v14, %v2845_v0 }
 0x225   : > { %v1961_v19 = vpop.f32.mrf.mxu0  ;;  %v2073_v20 = vpop.f32.mrf.mxu1 }
 0x226   : > { %v1598_v21 = vadd.f32 %v2071_v18, %v1437_v17  ;;  %v1962_v60 = vadd.f32 %v1961_v19, %v1960_v15  ;;  %v2074_v59 = vadd.f32 %v2073_v20, %v2072_v16 }
 0x227   : > { %v1963_v22 = vpop.f32.mrf.mxu0  ;;  %v2075_v61 = vpop.f32.mrf.mxu1 }
 0x228   : > { %1706 = vst [vmem:[%s2850_s13 + $0x30] sm:$0xff] %v1598_v21  ;;  %v1440_v23 = vadd.f32 %v1962_v60, %v2845_v0 }
 0x229   : > { %v1964_v24 = vpop.f32.mrf.mxu0  ;;  %v2076_v25 = vpop.f32.mrf.mxu1 }
 0x22a   : > { %v1601_v26 = vadd.f32 %v2074_v59, %v1440_v23  ;;  %v1965_v27 = vadd.f32 %v1964_v24, %v1963_v22  ;;  %v2077_v31 = vadd.f32 %v2076_v25, %v2075_v61 }
 0x22b   : > { %v1966_v28 = vpop.f32.mrf.mxu0  ;;  %v2078_v29 = vpop.f32.mrf.mxu1 }
 0x22c   : > { %1707 = vst [vmem:[%s2850_s13 + $0x38] sm:$0xff] %v1601_v26  ;;  %v1445_v30 = vadd.f32 %v1965_v27, %v2845_v0 }
 0x22d   : > { %v1967_v32 = vpop.f32.mrf.mxu0  ;;  %v2079_v33 = vpop.f32.mrf.mxu1 }
 0x22e   : > { %v1606_v34 = vadd.f32 %v2077_v31, %v1445_v30  ;;  %v1968_v35 = vadd.f32 %v1967_v32, %v1966_v28  ;;  %v2080_v39 = vadd.f32 %v2079_v33, %v2078_v29 }
 0x22f   : > { %v1969_v36 = vpop.f32.mrf.mxu0  ;;  %v2081_v37 = vpop.f32.mrf.mxu1 }
 0x230   : > { %1708 = vst [vmem:[%s2850_s13 + $0x40] sm:$0xff] %v1606_v34  ;;  %v1448_v38 = vadd.f32 %v1968_v35, %v2845_v0 }
 0x231   : > { %v1970_v40 = vpop.f32.mrf.mxu0  ;;  %v2082_v41 = vpop.f32.mrf.mxu1 }
 0x232   : > { %v1609_v42 = vadd.f32 %v2080_v39, %v1448_v38  ;;  %v1971_v43 = vadd.f32 %v1970_v40, %v1969_v36  ;;  %v2083_v47 = vadd.f32 %v2082_v41, %v2081_v37 }
 0x233   : > { %v1972_v44 = vpop.f32.mrf.mxu0  ;;  %v2084_v45 = vpop.f32.mrf.mxu1 }
 0x234   : > { %1709 = vst [vmem:[%s2850_s13 + $0x48] sm:$0xff] %v1609_v42  ;;  %v1453_v46 = vadd.f32 %v1971_v43, %v2845_v0 }
 0x235   : > { %v1973_v48 = vpop.f32.mrf.mxu0  ;;  %v2085_v49 = vpop.f32.mrf.mxu1 }
 0x236   : > { %v1614_v50 = vadd.f32 %v2083_v47, %v1453_v46  ;;  %v1974_v51 = vadd.f32 %v1973_v48, %v1972_v44  ;;  %v2086_v55 = vadd.f32 %v2085_v49, %v2084_v45 }
 0x237   : > { %v1975_v52 = vpop.f32.mrf.mxu0  ;;  %v2087_v53 = vpop.f32.mrf.mxu1 }
 0x238   : > { %1710 = vst [vmem:[%s2850_s13 + $0x50] sm:$0xff] %v1614_v50  ;;  %v1456_v54 = vadd.f32 %v1974_v51, %v2845_v0 }
 0x239   : > { %v1976_v56 = vpop.f32.mrf.mxu0  ;;  %v2088_v57 = vpop.f32.mrf.mxu1 }
 0x23a   : > { %v1617_v58 = vadd.f32 %v2086_v55, %v1456_v54  ;;  %v1977_v62 = vadd.f32 %v1976_v56, %v1975_v52  ;;  %v2089_v3 = vadd.f32 %v2088_v57, %v2087_v53 }
 0x23b   : > { %v1978_v63 = vpop.f32.mrf.mxu0  ;;  %v2090_v1 = vpop.f32.mrf.mxu1 }
 0x23c   : > { %1711 = vst [vmem:[%s2850_s13 + $0x58] sm:$0xff] %v1617_v58  ;;  %v1461_v2 = vadd.f32 %v1977_v62, %v2845_v0 }
 0x23d   : > { %v1979_v4 = vpop.f32.mrf.mxu0  ;;  %v2091_v5 = vpop.f32.mrf.mxu1 }
 0x23e   : > { %v1622_v6 = vadd.f32 %v2089_v3, %v1461_v2  ;;  %v1980_v7 = vadd.f32 %v1979_v4, %v1978_v63  ;;  %v2092_v11 = vadd.f32 %v2091_v5, %v2090_v1 }
 0x23f   : > { %v1981_v8 = vpop.f32.mrf.mxu0  ;;  %v2093_v9 = vpop.f32.mrf.mxu1 }
 0x240   : > { %1712 = vst [vmem:[%s2850_s13 + $0x60] sm:$0xff] %v1622_v6  ;;  %v1464_v10 = vadd.f32 %v1980_v7, %v2845_v0 }
 0x241   : > { %v1982_v12 = vpop.f32.mrf.mxu0  ;;  %v2094_v13 = vpop.f32.mrf.mxu1 }
 0x242   : > { %v1625_v14 = vadd.f32 %v2092_v11, %v1464_v10  ;;  %v1983_v15 = vadd.f32 %v1982_v12, %v1981_v8  ;;  %v2095_v19 = vadd.f32 %v2094_v13, %v2093_v9 }
 0x243   : > { %v1984_v16 = vpop.f32.mrf.mxu0  ;;  %v2096_v17 = vpop.f32.mrf.mxu1 }
 0x244   : > { %1713 = vst [vmem:[%s2850_s13 + $0x68] sm:$0xff] %v1625_v14  ;;  %v1469_v18 = vadd.f32 %v1983_v15, %v2845_v0 }
 0x245   : > { %v1985_v20 = vpop.f32.mrf.mxu0  ;;  %v2097_v21 = vpop.f32.mrf.mxu1 }
 0x246   : > { %v1630_v60 = vadd.f32 %v2095_v19, %v1469_v18  ;;  %v1986_v22 = vadd.f32 %v1985_v20, %v1984_v16  ;;  %v2098_v24 = vadd.f32 %v2097_v21, %v2096_v17 }
 0x247   : > { %v1987_v61 = vpop.f32.mrf.mxu0  ;;  %v2099_v23 = vpop.f32.mrf.mxu1 }
 0x248   : > { %1714 = vst [vmem:[%s2850_s13 + $0x70] sm:$0xff] %v1630_v60  ;;  %v1472_v59 = vadd.f32 %v1986_v22, %v2845_v0 }
 0x249   : > { %v1988_v25 = vpop.f32.mrf.mxu0  ;;  %v2100_v26 = vpop.f32.mrf.mxu1 }
 0x24a   : > { %v1633_v27 = vadd.f32 %v2098_v24, %v1472_v59  ;;  %v1989_v28 = vadd.f32 %v1988_v25, %v1987_v61  ;;  %v2101_v32 = vadd.f32 %v2100_v26, %v2099_v23 }
 0x24b   : > { %v1990_v29 = vpop.f32.mrf.mxu0  ;;  %v2102_v30 = vpop.f32.mrf.mxu1 }
 0x24c   : > { %1715 = vst [vmem:[%s2850_s13 + $0x78] sm:$0xff] %v1633_v27  ;;  %v1477_v31 = vadd.f32 %v1989_v28, %v2845_v0 }
 0x24d   : > { %v1991_v33 = vpop.f32.mrf.mxu0  ;;  %v2103_v34 = vpop.f32.mrf.mxu1 }
 0x24e   : > { %v1638_v35 = vadd.f32 %v2101_v32, %v1477_v31  ;;  %v1992_v36 = vadd.f32 %v1991_v33, %v1990_v29  ;;  %v2104_v40 = vadd.f32 %v2103_v34, %v2102_v30 }
 0x24f   : > { %v1993_v37 = vpop.f32.mrf.mxu0  ;;  %v2105_v38 = vpop.f32.mrf.mxu1 }
 0x250   : > { %1716 = vst [vmem:[%s2850_s13 + $0x80] sm:$0xff] %v1638_v35  ;;  %v1480_v39 = vadd.f32 %v1992_v36, %v2845_v0 }
 0x251   : > { %v1994_v41 = vpop.f32.mrf.mxu0  ;;  %v2106_v42 = vpop.f32.mrf.mxu1 }
 0x252   : > { %v1641_v43 = vadd.f32 %v2104_v40, %v1480_v39  ;;  %v1995_v44 = vadd.f32 %v1994_v41, %v1993_v37  ;;  %v2107_v48 = vadd.f32 %v2106_v42, %v2105_v38 }
 0x253   : > { %v1996_v45 = vpop.f32.mrf.mxu0  ;;  %v2108_v46 = vpop.f32.mrf.mxu1 }
 0x254   : > { %1717 = vst [vmem:[%s2850_s13 + $0x88] sm:$0xff] %v1641_v43  ;;  %v1485_v47 = vadd.f32 %v1995_v44, %v2845_v0 }
 0x255   : > { %v1997_v49 = vpop.f32.mrf.mxu0  ;;  %v2109_v50 = vpop.f32.mrf.mxu1 }
 0x256   : > { %v1646_v51 = vadd.f32 %v2107_v48, %v1485_v47  ;;  %v1998_v52 = vadd.f32 %v1997_v49, %v1996_v45  ;;  %v2110_v56 = vadd.f32 %v2109_v50, %v2108_v46 }
 0x257   : > { %v1999_v53 = vpop.f32.mrf.mxu0  ;;  %v2111_v54 = vpop.f32.mrf.mxu1 }
 0x258   : > { %1718 = vst [vmem:[%s2850_s13 + $0x90] sm:$0xff] %v1646_v51  ;;  %v1488_v55 = vadd.f32 %v1998_v52, %v2845_v0 }
 0x259   : > { %v2000_v57 = vpop.f32.mrf.mxu0  ;;  %v2112_v58 = vpop.f32.mrf.mxu1 }
 0x25a   : > { %v1649_v62 = vadd.f32 %v2110_v56, %v1488_v55  ;;  %v2001_v63 = vadd.f32 %v2000_v57, %v1999_v53  ;;  %v2113_v4 = vadd.f32 %v2112_v58, %v2111_v54 }
 0x25b   : > { %v2002_v1 = vpop.f32.mrf.mxu0  ;;  %v2114_v2 = vpop.f32.mrf.mxu1 }
 0x25c   : > { %1719 = vst [vmem:[%s2850_s13 + $0x98] sm:$0xff] %v1649_v62  ;;  %v1493_v3 = vadd.f32 %v2001_v63, %v2845_v0 }
 0x25d   : > { %v2003_v5 = vpop.f32.mrf.mxu0  ;;  %v2115_v6 = vpop.f32.mrf.mxu1 }
 0x25e   : > { %v1654_v7 = vadd.f32 %v2113_v4, %v1493_v3  ;;  %v2004_v8 = vadd.f32 %v2003_v5, %v2002_v1  ;;  %v2116_v12 = vadd.f32 %v2115_v6, %v2114_v2 }
 0x25f   : > { %v2005_v9 = vpop.f32.mrf.mxu0  ;;  %v2117_v10 = vpop.f32.mrf.mxu1 }
 0x260   : > { %1720 = vst [vmem:[%s2850_s13 + $0xa0] sm:$0xff] %v1654_v7  ;;  %v1496_v11 = vadd.f32 %v2004_v8, %v2845_v0 }
 0x261   : > { %v2006_v13 = vpop.f32.mrf.mxu0  ;;  %v2118_v14 = vpop.f32.mrf.mxu1 }
 0x262   : > { %v1657_v15 = vadd.f32 %v2116_v12, %v1496_v11  ;;  %v2007_v16 = vadd.f32 %v2006_v13, %v2005_v9  ;;  %v2119_v20 = vadd.f32 %v2118_v14, %v2117_v10 }
 0x263   : > { %v2008_v17 = vpop.f32.mrf.mxu0  ;;  %v2120_v18 = vpop.f32.mrf.mxu1 }
 0x264   : > { %1721 = vst [vmem:[%s2850_s13 + $0xa8] sm:$0xff] %v1657_v15  ;;  %v1501_v19 = vadd.f32 %v2007_v16, %v2845_v0 }
 0x265   : > { %v2009_v21 = vpop.f32.mrf.mxu0  ;;  %v2121_v60 = vpop.f32.mrf.mxu1 }
 0x266   : > { %v1662_v22 = vadd.f32 %v2119_v20, %v1501_v19  ;;  %v2010_v61 = vadd.f32 %v2009_v21, %v2008_v17  ;;  %v2122_v25 = vadd.f32 %v2121_v60, %v2120_v18 }
 0x267   : > { %v2011_v23 = vpop.f32.mrf.mxu0  ;;  %v2123_v59 = vpop.f32.mrf.mxu1 }
 0x268   : > { %1722 = vst [vmem:[%s2850_s13 + $0xb0] sm:$0xff] %v1662_v22  ;;  %v1504_v24 = vadd.f32 %v2010_v61, %v2845_v0 }
 0x269   : > { %v2012_v26 = vpop.f32.mrf.mxu0  ;;  %v2124_v27 = vpop.f32.mrf.mxu1 }
 0x26a   : > { %v1665_v28 = vadd.f32 %v2122_v25, %v1504_v24  ;;  %v2013_v29 = vadd.f32 %v2012_v26, %v2011_v23  ;;  %v2125_v33 = vadd.f32 %v2124_v27, %v2123_v59 }
 0x26b   : > { %v2014_v30 = vpop.f32.mrf.mxu0  ;;  %v2126_v31 = vpop.f32.mrf.mxu1 }
 0x26c   : > { %1723 = vst [vmem:[%s2850_s13 + $0xb8] sm:$0xff] %v1665_v28  ;;  %v1509_v32 = vadd.f32 %v2013_v29, %v2845_v0 }
 0x26d   : > { %v2015_v34 = vpop.f32.mrf.mxu0  ;;  %v2127_v35 = vpop.f32.mrf.mxu1 }
 0x26e   : > { %v1670_v36 = vadd.f32 %v2125_v33, %v1509_v32  ;;  %v2016_v37 = vadd.f32 %v2015_v34, %v2014_v30  ;;  %v2128_v41 = vadd.f32 %v2127_v35, %v2126_v31 }
 0x26f   : > { %v2017_v38 = vpop.f32.mrf.mxu0  ;;  %v2129_v39 = vpop.f32.mrf.mxu1 }
 0x270   : > { %1724 = vst [vmem:[%s2850_s13 + $0xc0] sm:$0xff] %v1670_v36  ;;  %v1512_v40 = vadd.f32 %v2016_v37, %v2845_v0 }
 0x271   : > { %v2018_v42 = vpop.f32.mrf.mxu0  ;;  %v2130_v43 = vpop.f32.mrf.mxu1 }
 0x272   : > { %v1673_v44 = vadd.f32 %v2128_v41, %v1512_v40  ;;  %v2019_v45 = vadd.f32 %v2018_v42, %v2017_v38  ;;  %v2131_v49 = vadd.f32 %v2130_v43, %v2129_v39 }
 0x273   : > { %v2020_v46 = vpop.f32.mrf.mxu0  ;;  %v2132_v47 = vpop.f32.mrf.mxu1 }
 0x274   : > { %1725 = vst [vmem:[%s2850_s13 + $0xc8] sm:$0xff] %v1673_v44  ;;  %v1517_v48 = vadd.f32 %v2019_v45, %v2845_v0 }
 0x275   : > { %v2021_v50 = vpop.f32.mrf.mxu0  ;;  %v2133_v51 = vpop.f32.mrf.mxu1 }
 0x276   : > { %v1678_v52 = vadd.f32 %v2131_v49, %v1517_v48  ;;  %v2022_v53 = vadd.f32 %v2021_v50, %v2020_v46  ;;  %v2134_v57 = vadd.f32 %v2133_v51, %v2132_v47 }
 0x277   : > { %v2023_v54 = vpop.f32.mrf.mxu0  ;;  %v2135_v55 = vpop.f32.mrf.mxu1 }
 0x278   : > { %1726 = vst [vmem:[%s2850_s13 + $0xd0] sm:$0xff] %v1678_v52  ;;  %v1520_v56 = vadd.f32 %v2022_v53, %v2845_v0 }
 0x279   : > { %v2024_v58 = vpop.f32.mrf.mxu0  ;;  %v2136_v62 = vpop.f32.mrf.mxu1 }
 0x27a   : > { %v1681_v63 = vadd.f32 %v2134_v57, %v1520_v56  ;;  %v2025_v1 = vadd.f32 %v2024_v58, %v2023_v54  ;;  %v2137_v5 = vadd.f32 %v2136_v62, %v2135_v55 }
 0x27b   : > { %v2026_v2 = vpop.f32.mrf.mxu0  ;;  %v2138_v3 = vpop.f32.mrf.mxu1 }
 0x27c   : > { %1727 = vst [vmem:[%s2850_s13 + $0xd8] sm:$0xff] %v1681_v63  ;;  %v1525_v4 = vadd.f32 %v2025_v1, %v2845_v0 }
 0x27d   : > { %v2027_v6 = vpop.f32.mrf.mxu0  ;;  %v2139_v7 = vpop.f32.mrf.mxu1 }
 0x27e   : > { %v1686_v8 = vadd.f32 %v2137_v5, %v1525_v4  ;;  %v2028_v9 = vadd.f32 %v2027_v6, %v2026_v2  ;;  %v2140_v13 = vadd.f32 %v2139_v7, %v2138_v3 }
 0x27f   : > { %v2029_v10 = vpop.f32.mrf.mxu0  ;;  %v2141_v11 = vpop.f32.mrf.mxu1 }
 0x280   : > { %1728 = vst [vmem:[%s2850_s13 + $0xe0] sm:$0xff] %v1686_v8  ;;  %v1528_v12 = vadd.f32 %v2028_v9, %v2845_v0 }
 0x281   : > { %v2030_v14 = vpop.f32.mrf.mxu0  ;;  %v2142_v15 = vpop.f32.mrf.mxu1 }
 0x282   : > { %v1689_v16 = vadd.f32 %v2140_v13, %v1528_v12  ;;  %v2031_v17 = vadd.f32 %v2030_v14, %v2029_v10  ;;  %v2143_v21 = vadd.f32 %v2142_v15, %v2141_v11 }
 0x283   : > { %v2032_v18 = vpop.f32.mrf.mxu0  ;;  %v2144_v19 = vpop.f32.mrf.mxu1 }
 0x284   : > { %1729 = vst [vmem:[%s2850_s13 + $0xe8] sm:$0xff] %v1689_v16  ;;  %v1533_v20 = vadd.f32 %v2031_v17, %v2845_v0 }
 0x285   : > { %v2033_v60 = vpop.f32.mrf.mxu0  ;;  %v2145_v22 = vpop.f32.mrf.mxu1 }
 0x286   : > { %v1694_v61 = vadd.f32 %v2143_v21, %v1533_v20  ;;  %v2034_v23 = vadd.f32 %v2033_v60, %v2032_v18  ;;  %v2146_v24 = vadd.f32 %v2145_v22, %v2144_v19 }
 0x288   : > { %1730 = vst [vmem:[%s2850_s13 + $0xf0] sm:$0xff] %v1694_v61  ;;  %v1536_v59 = vadd.f32 %v2034_v23, %v2845_v0 }
 0x28a   : > { %v1697_v25 = vadd.f32 %v2146_v24, %v1536_v59 }
 0x28c   : > { %1731 = vst [vmem:[%s2850_s13 + $0xf8] sm:$0xff] %v1697_v25 }
 0x28d   : > { %2396 = shalt.err (!%p2393_p9)
}
 0x28e   : > { %s2397_s6 = scalar_lea.hbm %s2919_s11, 4096  ;;  %s2401_s10 = scalar_lea.hbm %s2970_s5, 8192 }
 0x28f   : > { %p2398_p13 = scmp.ne.s32.totalorder %s2919_s11, %s2397_s6  ;;  %p2402_p4 = scmp.lt.s32.totalorder %s2919_s11, %s2970_s5 }
 0x290   : > { %p2403_p8 = scmp.lt.s32.totalorder %s2401_s10, %s2397_s6 }
 0x291   : > { %p2399_p5 = pnand %p2398_p13, %p2986_p10 }
 0x292   : > { %p2404_p7 = por %p2403_p8, %p2402_p4 }
 0x293   : > { %p2400_p0 = pneg %p2399_p5 }
 0x295   : > { %p2405_p11 = pnand %p2404_p7, %p2400_p0 }
 0x297   : > { %2408 = shalt.err (!%p2405_p11)
}
 0x298   : > { %s2464_s14 = smov 128   ;;  %s2465_s8 = smov 8  }
 0x299   : > { %2157 = dma.vmem_to_hbm [thread:$0]  (%p2986_p10), %s2921_s29, 4096, %s2919_s11, %s1733_s15, %s2464_s14, %s2464_s14, %s2465_s8  }
 0x29a PF: > { %s1761_s9 = sand.u32 1, %s2439_s18   ;;  %p2987_p1 = scmp.ne.s32.totalorder %s2976_s25, 0 }
 0x29b   : > { %p2988_p2 = scmp.ge.s32.totalorder %s2451_s21, 2  ;;  %s1762_s16 = scalar_lea.sflag [#allocation4], %s1761_s9 }
 0x29d   : > { %p2171_p6 = pnand %p2988_p2, %p2987_p1 }
 0x29f   : > { %p2172_p12 = pneg %p2171_p6 }
 0x2a1   : > { %2434 = dma.done.wait (%p2172_p12), %s1762_s16, 4096  }
 0x2a2   : > { %2436 = vsyncadd (%p2172_p12), %s1762_s16, 4294963200  ;;  %p19_p3 = scmp.ge.s32.totalorder %s2568_s17, 4   ;;  %s2989_s18 = smov %s2443_s19 }
 0x2a3   : > { %s2990_s19 = smov %s2447_s20  ;;  %s2991_s20 = smov %s2577_s28 }
 0x2a4   : > { %s2992_s21 = smov %s2568_s17  ;;  %21 = sbr.rel (!%p19_p3) target bundleno = 6 (0x6), region = 93 }
 0x2a9   :  { %1767 = vsyncpa [#allocation3], 1 }
 0x2aa   :  { %1769 = vsyncpa [#allocation3 + $0x1], 1 }
 0x2ab   :  { %1770 = vsyncpa [#allocation6], 1 }
 0x2ac   :  { %1771 = vsyncpa [#allocation4], 1 }
 0x2ad   :  { %1773 = vsyncpa [#allocation4 + $0x1], 1 }

</bundles_post_ra>
